<compile_context>
chip_gen: v5e
topology: v5e:2x2
jax: 0.10.0
libtpu: 0.0.40
codegen_flags: <defaults>
</compile_context>

<pallas_src>
import math
import functools

import numpy as np
import jax
import jax.numpy as jnp
from jax.experimental import pallas as pl
from jax.experimental.pallas import tpu as pltpu

# ---------------- config (small synthetic model) ----------------
VOCAB = 128
D_MODEL = 32
N_HEADS = 4
HEAD_DIM = D_MODEL // N_HEADS
D_FF = 64
N_LAYERS = 2
MAX_POS = 64
LN_EPS = 1e-5
NEG_INF = float(jnp.finfo(jnp.float32).min)

# ---------------- packed per-layer parameter slab layout (static lane offsets) -------
# weight slab (D_MODEL rows):  [ s_wqkv | s_wo | c_wq | c_wkv | c_wo | w1 ]
O_SQKV = 0                       # width 3D   (scale folded into q columns)
O_SWO = 3 * D_MODEL              # width D
O_CWQ = 4 * D_MODEL              # width D    (scale folded)
O_CKV = 5 * D_MODEL              # width 2D
O_CWO = 7 * D_MODEL              # width D
O_W1 = 8 * D_MODEL               # width D_FF
W_TOT = 8 * D_MODEL + D_FF

# bias / layernorm slab (1 row):
V_SBQKV = 0                      # width 3D   (scale folded into q part)
V_SBO = 3 * D_MODEL
V_LN1G = 4 * D_MODEL
V_LN1B = 5 * D_MODEL
V_CBQ = 6 * D_MODEL              # (scale folded)
V_CBKV = 7 * D_MODEL             # width 2D
V_CBO = 9 * D_MODEL
V_LN2G = 10 * D_MODEL
V_LN2B = 11 * D_MODEL
V_B1 = 12 * D_MODEL              # width D_FF
V_B2 = 12 * D_MODEL + D_FF
V_LN3G = 13 * D_MODEL + D_FF
V_LN3B = 14 * D_MODEL + D_FF
V_TOT = 15 * D_MODEL + D_FF


# ---------------- in-kernel helpers (trace-time) ----------------
def _layernorm(x2, g, b):
    mean = jnp.mean(x2, axis=-1, keepdims=True)
    var = jnp.mean(jnp.square(x2 - mean), axis=-1, keepdims=True)
    return (x2 - mean) * jax.lax.rsqrt(var + LN_EPS) * g + b


def _mha(q2, k2, v2, bias, wo, bo, B, Tq, Tk, H, hd):
    """Multi-head attention. q2:(B*Tq,D) (scale already folded into weights),
    k2,v2:(B*Tk,D), bias broadcastable to (B,Tq,Tk), wo:(D,D), bo:(1,D).
    Per-head score/ctx einsums (single batch dim b), then ONE output projection
    of the lane-concatenated context."""
    ctx_parts = []
    for hh in range(H):
        lo = hh * hd
        qh = q2[:, lo:lo + hd].reshape(B, Tq, hd)
        kh = k2[:, lo:lo + hd].reshape(B, Tk, hd)
        vh = v2[:, lo:lo + hd].reshape(B, Tk, hd)
        s = jnp.einsum('bqd,bkd->bqk', qh, kh,
                       preferred_element_type=jnp.float32) + bias
        s = s - jnp.max(s, axis=-1, keepdims=True)
        p = jnp.exp(s)
        p = p * pl.reciprocal(jnp.sum(p, axis=-1, keepdims=True), approx=True)
        ctx = jnp.einsum('bqk,bkd->bqd', p, vh,
                         preferred_element_type=jnp.float32)        # (B,Tq,hd)
        ctx_parts.append(ctx.reshape(B * Tq, hd))
    ctx_all = ctx_parts[0] if H == 1 else jnp.concatenate(ctx_parts, axis=-1)
    return jnp.dot(ctx_all, wo, preferred_element_type=jnp.float32) + bo


# ---------------- fused whole-decoder kernel (grid = layers) ----------------
def _fused_decoder_kernel(
    h0_ref, enc_ref, encb_ref, wsl_ref, w2_ref, vsl_ref, embT_ref, fb_ref,
    logits_ref, skv_ref, ckv_ref,
    h_scr,
    *, B, T, Te, H, hd, n_layers,
):
    D = H * hd
    l = pl.program_id(0)

    # hidden state lives in VMEM scratch across the layer axis
    @pl.when(l == 0)
    def _init():
        h_scr[...] = h0_ref[...]

    x2 = h_scr[...]                                            # (B*T, D)

    # ---- causal self-attention (fused QKV matmul) ----
    qkv = jnp.dot(x2, wsl_ref[:, O_SQKV:O_SQKV + 3 * D],
                  preferred_element_type=jnp.float32) + vsl_ref[:, V_SBQKV:V_SBQKV + 3 * D]
    # lane-dense packed self K||V cache write (split into heads in the wrapper)
    skv_ref[...] = qkv[:, D:3 * D]

    row = jax.lax.broadcasted_iota(jnp.int32, (T, T), 0)
    col = jax.lax.broadcasted_iota(jnp.int32, (T, T), 1)
    causal = jnp.where(col <= row, jnp.float32(0.0), jnp.float32(NEG_INF))[None]  # (1,T,T)

    attn = _mha(qkv[:, 0:D], qkv[:, D:2 * D], qkv[:, 2 * D:3 * D], causal,
                wsl_ref[:, O_SWO:O_SWO + D], vsl_ref[:, V_SBO:V_SBO + D],
                B, T, T, H, hd)
    h2 = _layernorm(attn + x2,
                    vsl_ref[:, V_LN1G:V_LN1G + D], vsl_ref[:, V_LN1B:V_LN1B + D])

    # ---- cross-attention over encoder hidden states (fused KV matmul) ----
    e2 = enc_ref[...]                                          # (B*Te, D)
    qc = jnp.dot(h2, wsl_ref[:, O_CWQ:O_CWQ + D],
                 preferred_element_type=jnp.float32) + vsl_ref[:, V_CBQ:V_CBQ + D]
    kvc = jnp.dot(e2, wsl_ref[:, O_CKV:O_CKV + 2 * D],
                  preferred_element_type=jnp.float32) + vsl_ref[:, V_CBKV:V_CBKV + 2 * D]
    ckv_ref[...] = kvc                                         # lane-dense cross K||V

    enc_bias = encb_ref[...]                                   # (B, 1, Te), broadcast in-kernel
    cattn = _mha(qc, kvc[:, 0:D], kvc[:, D:2 * D], enc_bias,
                 wsl_ref[:, O_CWO:O_CWO + D], vsl_ref[:, V_CBO:V_CBO + D],
                 B, T, Te, H, hd)
    h3 = _layernorm(cattn + h2,
                    vsl_ref[:, V_LN2G:V_LN2G + D], vsl_ref[:, V_LN2B:V_LN2B + D])

    # ---- feed forward (SiLU) ----
    f = jnp.dot(h3, wsl_ref[:, O_W1:O_W1 + D_FF],
                preferred_element_type=jnp.float32) + vsl_ref[:, V_B1:V_B1 + D_FF]
    f = f * jax.nn.sigmoid(f)
    f = jnp.dot(f, w2_ref[...],
                preferred_element_type=jnp.float32) + vsl_ref[:, V_B2:V_B2 + D]
    h4 = _layernorm(f + h3,
                    vsl_ref[:, V_LN3G:V_LN3G + D], vsl_ref[:, V_LN3B:V_LN3B + D])
    h_scr[...] = h4

    # ---- LM head epilogue (tied embedding, pre-transposed) ----
    @pl.when(l == n_layers - 1)
    def _epilogue():
        logits_ref[...] = jnp.dot(h4, embT_ref[...],
                                  preferred_element_type=jnp.float32) + fb_ref[...]


# ---------------- parameters (deterministic synthetic init, packed slabs) -----------
def sinusoidal_positions(n_pos, dim):
    # Matches MarianSinusoidalPositionalEmbedding._init_weight
    pos_enc = np.array(
        [[p / np.power(10000.0, 2 * (j // 2) / dim) for j in range(dim)] for p in range(n_pos)]
    )
    out = np.zeros((n_pos, dim), dtype=np.float32)
    sentinel = dim // 2 + dim % 2
    out[:, :sentinel] = np.sin(pos_enc[:, 0::2])
    out[:, sentinel:] = np.cos(pos_enc[:, 1::2])
    return jnp.asarray(out)


def init_params(seed=0):
    key = jax.random.PRNGKey(seed)
    keys = iter(jax.random.split(key, 256))

    def nrm(shape):
        return jax.random.normal(next(keys), shape, jnp.float32) * 0.02

    D = D_MODEL
    scale = 1.0 / math.sqrt(HEAD_DIM)
    embed = nrm((VOCAB, D))
    ones = jnp.ones((1, D), jnp.float32)
    zeros = jnp.zeros((1, D), jnp.float32)

    wslabs, w2slabs, vslabs = [], [], []
    for _ in range(N_LAYERS):
        s_wq, s_bq = nrm((D, D)), nrm((1, D))
        s_wk, s_bk = nrm((D, D)), nrm((1, D))
        s_wv, s_bv = nrm((D, D)), nrm((1, D))
        s_wo, s_bo = nrm((D, D)), nrm((1, D))
        c_wq, c_bq = nrm((D, D)), nrm((1, D))
        c_wk, c_bk = nrm((D, D)), nrm((1, D))
        c_wv, c_bv = nrm((D, D)), nrm((1, D))
        c_wo, c_bo = nrm((D, D)), nrm((1, D))
        w1, b1 = nrm((D, D_FF)), nrm((1, D_FF))
        w2, b2 = nrm((D_FF, D)), nrm((1, D))
        # 1/sqrt(head_dim) folded into Q projections (constant fold, zero runtime cost)
        wslab = jnp.concatenate(
            [s_wq * scale, s_wk, s_wv, s_wo, c_wq * scale, c_wk, c_wv, c_wo, w1], axis=1)
        vslab = jnp.concatenate(
            [s_bq * scale, s_bk, s_bv, s_bo, ones, zeros,
             c_bq * scale, c_bk, c_bv, c_bo, ones, zeros,
             b1, b2, ones, zeros], axis=1)
        assert wslab.shape == (D, W_TOT) and vslab.shape == (1, V_TOT)
        wslabs.append(wslab)
        w2slabs.append(w2)
        vslabs.append(vslab)

    return {
        "embed": embed,                    # (V, D) for the input gather (tied)
        "embed_T": embed.T,                # (D, V) pre-transposed once for the LM head
        "final_logits_bias": nrm((1, VOCAB)),
        "pos": sinusoidal_positions(MAX_POS, D),
        "wslab": jnp.stack(wslabs),        # (L, D, W_TOT)
        "w2slab": jnp.stack(w2slabs),      # (L, D_FF, D)
        "vslab": jnp.stack(vslabs),        # (L, 1, V_TOT)
    }


# ---------------- forward pass (glue in JAX, hot path = ONE pallas_call) -------------
def decoder_with_lm_head_initial(params, input_ids, attention_mask, encoder_hidden_states):
    B, T = input_ids.shape
    Te = encoder_hidden_states.shape[1]
    D = D_MODEL
    H, hd = N_HEADS, HEAD_DIM

    # TODO(synk): embedding gather + positional lookup stay as JAX glue (tiny, no matmul).
    h0 = params["embed"][input_ids] * math.sqrt(D) + params["pos"][:T][None, :, :]
    h0 = h0.astype(jnp.float32).reshape(B * T, D)
    enc = encoder_hidden_states.astype(jnp.float32).reshape(B * Te, D)

    # HF convention: 0 where attended, finfo.min where masked (fully-masked row -> NaN, as HF).
    enc_bias = ((1.0 - attention_mask.astype(jnp.float32)) * NEG_INF)[:, None, :]  # (B,1,Te)

    kern = functools.partial(_fused_decoder_kernel,
                             B=B, T=T, Te=Te, H=H, hd=hd, n_layers=N_LAYERS)

    grid_spec = pltpu.PrefetchScalarGridSpec(
        num_scalar_prefetch=0,
        grid=(N_LAYERS,),
        in_specs=[
            pl.BlockSpec((B * T, D), lambda l: (0, 0)),            # h0 (resident)
            pl.BlockSpec((B * Te, D), lambda l: (0, 0)),           # encoder states (resident)
            pl.BlockSpec((B, 1, Te), lambda l: (0, 0, 0)),         # encoder padding bias
            pl.BlockSpec((None, D, W_TOT), lambda l: (l, 0, 0)),   # per-layer weight slab
            pl.BlockSpec((None, D_FF, D), lambda l: (l, 0, 0)),    # per-layer w2
            pl.BlockSpec((None, 1, V_TOT), lambda l: (l, 0, 0)),   # per-layer bias/LN slab
            pl.BlockSpec((D, VOCAB), lambda l: (0, 0)),            # tied embed^T (resident)
            pl.BlockSpec((1, VOCAB), lambda l: (0, 0)),            # final_logits_bias
        ],
        out_specs=(
            pl.BlockSpec((B * T, VOCAB), lambda l: (0, 0)),        # logits (written at last l)
            pl.BlockSpec((None, B * T, 2 * D), lambda l: (l, 0, 0)),   # self  K||V per layer
            pl.BlockSpec((None, B * Te, 2 * D), lambda l: (l, 0, 0)),  # cross K||V per layer
        ),
        scratch_shapes=[pltpu.VMEM((B * T, D), jnp.float32)],      # hidden carried across layers
    )
    out_shape = (
        jax.ShapeDtypeStruct((B * T, VOCAB), jnp.float32),
        jax.ShapeDtypeStruct((N_LAYERS, B * T, 2 * D), jnp.float32),
        jax.ShapeDtypeStruct((N_LAYERS, B * Te, 2 * D), jnp.float32),
    )

    logits2, skv, ckv = pl.pallas_call(
        kern,
        out_shape=out_shape,
        grid_spec=grid_spec,
        compiler_params=pltpu.CompilerParams(dimension_semantics=("arbitrary",)),
    )(h0, enc, enc_bias, params["wslab"], params["w2slab"], params["vslab"],
      params["embed_T"], params["final_logits_bias"])

    logits = logits2.reshape(B, T, VOCAB)

    # lane-dense K||V packs -> HF (B, H, S, hd) layout (free layout plumbing in the wrapper)
    def split_heads(kv, S):
        k = kv[..., :D].reshape(N_LAYERS, B, S, H, hd).transpose(0, 1, 3, 2, 4)
        v = kv[..., D:].reshape(N_LAYERS, B, S, H, hd).transpose(0, 1, 3, 2, 4)
        return k, v

    sk, sv = split_heads(skv.reshape(N_LAYERS, B, T, 2 * D), T)
    ck, cv = split_heads(ckv.reshape(N_LAYERS, B, Te, 2 * D), Te)
    present = tuple((sk[i], sv[i], ck[i], cv[i]) for i in range(N_LAYERS))
    return logits, present


# ---------------- driver ----------------
if __name__ == "__main__":
    B, T_DEC, T_ENC = 2, 8, 16

    params = init_params(0)

    key = jax.random.PRNGKey(0)
    k_ids, k_enc = jax.random.split(key, 2)
    input_ids = jax.random.randint(k_ids, (B, T_DEC), 0, VOCAB, dtype=jnp.int32)
    encoder_hidden_states = jax.random.normal(k_enc, (B, T_ENC, D_MODEL), jnp.float32)
    # second sequence has 4 padded encoder positions
    attention_mask = jnp.ones((B, T_ENC), dtype=jnp.int32).at[1, 12:].set(0)

    fwd = jax.jit(decoder_with_lm_head_initial)
    logits, past_key_values = fwd(params, input_ids, attention_mask, encoder_hidden_states)

    jax.block_until_ready(logits)
    jax.block_until_ready(past_key_values)

    assert logits.shape == (B, T_DEC, VOCAB)
    assert bool(jnp.all(jnp.isfinite(logits)))
    assert len(past_key_values) == N_LAYERS
    for (sk, sv, ck, cv) in past_key_values:
        assert sk.shape == (B, N_HEADS, T_DEC, HEAD_DIM)
        assert sv.shape == (B, N_HEADS, T_DEC, HEAD_DIM)
        assert ck.shape == (B, N_HEADS, T_ENC, HEAD_DIM)
        assert cv.shape == (B, N_HEADS, T_ENC, HEAD_DIM)
        assert bool(jnp.all(jnp.isfinite(sk))) and bool(jnp.all(jnp.isfinite(cv)))

    print("KERNEL_OK")
</pallas_src>

<mosaic_0001>
module attributes {stable_mosaic.version = 11 : i64} {
  func.func @_fused_decoder_kernel(%arg0: i32, %arg1: memref<16x32xf32, #tpu.memory_space<vmem>>, %arg2: memref<32x32xf32, #tpu.memory_space<vmem>>, %arg3: memref<2x1x16xf32, #tpu.memory_space<vmem>>, %arg4: memref<1x32x320xf32, #tpu.memory_space<vmem>>, %arg5: memref<1x64x32xf32, #tpu.memory_space<vmem>>, %arg6: memref<1x1x544xf32, #tpu.memory_space<vmem>>, %arg7: memref<32x128xf32, #tpu.memory_space<vmem>>, %arg8: memref<1x128xf32, #tpu.memory_space<vmem>>, %arg9: memref<16x128xf32, #tpu.memory_space<vmem>>, %arg10: memref<1x16x64xf32, #tpu.memory_space<vmem>>, %arg11: memref<1x32x64xf32, #tpu.memory_space<vmem>>, %arg12: memref<16x32xf32, #tpu.memory_space<vmem>>) attributes {dimension_semantics = [#tpu.dimension_semantics<arbitrary>], iteration_bounds = array<i64: 2>, scalar_prefetch = 0 : i64, scratch_operands = 1 : i64, tpu.core_type = #tpu.core_type<tc>, window_params = [{pipeline_mode = #tpu.pipeline_mode<synchronous>, transform_indices = @transform_0, window_bounds = array<i64: 16, 32>}, {pipeline_mode = #tpu.pipeline_mode<synchronous>, transform_indices = @transform_1, window_bounds = array<i64: 32, 32>}, {pipeline_mode = #tpu.pipeline_mode<synchronous>, transform_indices = @transform_2, window_bounds = array<i64: 2, 1, 16>}, {transform_indices = @transform_3, window_bounds = array<i64: 1, 32, 320>}, {transform_indices = @transform_4, window_bounds = array<i64: 1, 64, 32>}, {transform_indices = @transform_5, window_bounds = array<i64: 1, 1, 544>}, {pipeline_mode = #tpu.pipeline_mode<synchronous>, transform_indices = @transform_6, window_bounds = array<i64: 32, 128>}, {pipeline_mode = #tpu.pipeline_mode<synchronous>, transform_indices = @transform_7, window_bounds = array<i64: 1, 128>}, {pipeline_mode = #tpu.pipeline_mode<synchronous>, transform_indices = @transform_8, window_bounds = array<i64: 16, 128>}, {transform_indices = @transform_9, window_bounds = array<i64: 1, 16, 64>}, {transform_indices = @transform_10, window_bounds = array<i64: 1, 32, 64>}]} {
    %c0_i32 = arith.constant 0 : i32
    %0 = arith.cmpi eq, %arg0, %c0_i32 : i32
    %1 = arith.extui %0 : i1 to i32
    %c0_i32_0 = arith.constant 0 : i32
    %2 = arith.cmpi ne, %1, %c0_i32_0 : i32
    scf.if %2 {
      %c0_119 = arith.constant 0 : index
      %c0_120 = arith.constant 0 : index
      %335 = vector.load %arg1[%c0_119, %c0_120] : memref<16x32xf32, #tpu.memory_space<vmem>>, vector<16x32xf32>
      %c0_121 = arith.constant 0 : index
      %c0_122 = arith.constant 0 : index
      %336 = vector.load %arg12[%c0_121, %c0_122] : memref<16x32xf32, #tpu.memory_space<vmem>>, vector<16x32xf32>
      tpu.vector_store %arg12[%c0_121, %c0_122], %335 {strides = array<i32>} : memref<16x32xf32, #tpu.memory_space<vmem>>, vector<16x32xf32>,
    } else {
    }
    %c0 = arith.constant 0 : index
    %c0_1 = arith.constant 0 : index
    %3 = vector.load %arg12[%c0, %c0_1] : memref<16x32xf32, #tpu.memory_space<vmem>>, vector<16x32xf32>
    %c0_2 = arith.constant 0 : index
    %c0_3 = arith.constant 0 : index
    %c0_4 = arith.constant 0 : index
    %4 = vector.load %arg4[%c0_2, %c0_3, %c0_4] : memref<1x32x320xf32, #tpu.memory_space<vmem>>, vector<1x32x96xf32>
    %5 = vector.shape_cast %4 : vector<1x32x96xf32> to vector<32x96xf32>
    %cst = arith.constant dense<0.000000e+00> : vector<16x96xf32>
    %6 = tpu.matmul %3, %5, %cst {dimension_numbers = #tpu.dot_dimension_numbers<[1], [0], [0], [1], [0, 0, 1, 1], [], []>} : vector<16x32xf32>, vector<32x96xf32>, vector<16x96xf32> -> vector<16x96xf32>
    %c0_5 = arith.constant 0 : index
    %c0_6 = arith.constant 0 : index
    %c0_7 = arith.constant 0 : index
    %7 = vector.load %arg6[%c0_5, %c0_6, %c0_7] : memref<1x1x544xf32, #tpu.memory_space<vmem>>, vector<1x1x96xf32>
    %8 = vector.shape_cast %7 : vector<1x1x96xf32> to vector<1x96xf32>
    %9 = vector.broadcast %8 : vector<1x96xf32> to vector<16x96xf32>
    %10 = arith.addf %6, %9 : vector<16x96xf32>
    %11 = vector.extract_strided_slice %10 {offsets = [0, 32], sizes = [16, 64], strides = [1, 1]} : vector<16x96xf32> to vector<16x64xf32>
    %c0_8 = arith.constant 0 : index
    %c0_9 = arith.constant 0 : index
    %c0_10 = arith.constant 0 : index
    %12 = vector.load %arg10[%c0_8, %c0_9, %c0_10] : memref<1x16x64xf32, #tpu.memory_space<vmem>>, vector<1x16x64xf32>
    %13 = vector.shape_cast %12 : vector<1x16x64xf32> to vector<16x64xf32>
    %14 = vector.shape_cast %11 : vector<16x64xf32> to vector<1x16x64xf32>
    tpu.vector_store %arg10[%c0_8, %c0_9, %c0_10], %14 {strides = array<i32>} : memref<1x16x64xf32, #tpu.memory_space<vmem>>, vector<1x16x64xf32>,
    %15 = tpu.iota {dimensions = array<i32: 0>} : vector<8x8xi32>
    %16 = tpu.iota {dimensions = array<i32: 1>} : vector<8x8xi32>
    %17 = arith.cmpi sle, %16, %15 : vector<8x8xi32>
    %cst_11 = arith.constant 0.000000e+00 : f32
    %cst_12 = arith.constant -3.40282347E+38 : f32
    %18 = vector.broadcast %cst_11 : f32 to vector<8x8xf32>
    %19 = vector.broadcast %cst_12 : f32 to vector<8x8xf32>
    %20 = arith.select %17, %18, %19 : vector<8x8xi1>, vector<8x8xf32>
    %21 = vector.shape_cast %20 : vector<8x8xf32> to vector<1x8x8xf32>
    %22 = vector.extract_strided_slice %10 {offsets = [0, 0], sizes = [16, 32], strides = [1, 1]} : vector<16x96xf32> to vector<16x32xf32>
    %23 = vector.extract_strided_slice %10 {offsets = [0, 32], sizes = [16, 32], strides = [1, 1]} : vector<16x96xf32> to vector<16x32xf32>
    %24 = vector.extract_strided_slice %10 {offsets = [0, 64], sizes = [16, 32], strides = [1, 1]} : vector<16x96xf32> to vector<16x32xf32>
    %c0_13 = arith.constant 0 : index
    %c0_14 = arith.constant 0 : index
    %c96 = arith.constant 96 : index
    %25 = vector.load %arg4[%c0_13, %c0_14, %c96] : memref<1x32x320xf32, #tpu.memory_space<vmem>>, vector<1x32x32xf32>
    %26 = vector.shape_cast %25 : vector<1x32x32xf32> to vector<32x32xf32>
    %c0_15 = arith.constant 0 : index
    %c0_16 = arith.constant 0 : index
    %c96_17 = arith.constant 96 : index
    %27 = vector.load %arg6[%c0_15, %c0_16, %c96_17] : memref<1x1x544xf32, #tpu.memory_space<vmem>>, vector<1x1x32xf32>
    %28 = vector.shape_cast %27 : vector<1x1x32xf32> to vector<1x32xf32>
    %29 = vector.extract_strided_slice %22 {offsets = [0, 0], sizes = [16, 8], strides = [1, 1]} : vector<16x32xf32> to vector<16x8xf32>
    %30 = vector.shape_cast %29 : vector<16x8xf32> to vector<2x8x8xf32>
    %31 = vector.extract_strided_slice %23 {offsets = [0, 0], sizes = [16, 8], strides = [1, 1]} : vector<16x32xf32> to vector<16x8xf32>
    %32 = vector.shape_cast %31 : vector<16x8xf32> to vector<2x8x8xf32>
    %33 = vector.extract_strided_slice %24 {offsets = [0, 0], sizes = [16, 8], strides = [1, 1]} : vector<16x32xf32> to vector<16x8xf32>
    %34 = vector.shape_cast %33 : vector<16x8xf32> to vector<2x8x8xf32>
    "tpu.trace_start"() <{level = 10 : i32, message = "bqd,bkd->bqk"}> : () -> ()
    %cst_18 = arith.constant dense<0.000000e+00> : vector<2x8x8xf32>
    %35 = tpu.matmul %30, %32, %cst_18 {dimension_numbers = #tpu.dot_dimension_numbers<[2], [2], [1], [1], [0, 0, 0, 1, 1, 1], [0], [0]>} : vector<2x8x8xf32>, vector<2x8x8xf32>, vector<2x8x8xf32> -> vector<2x8x8xf32>
    "tpu.trace_stop"() : () -> ()
    %36 = vector.broadcast %21 : vector<1x8x8xf32> to vector<2x8x8xf32>
    %37 = arith.addf %35, %36 : vector<2x8x8xf32>
    %cst_19 = arith.constant dense<0xFF800000> : vector<2x8xf32>
    %38 = vector.multi_reduction <maximumf>, %37, %cst_19 [2] : vector<2x8x8xf32> to vector<2x8xf32>
    %39 = vector.shape_cast %38 : vector<2x8xf32> to vector<2x8x1xf32>
    %40 = vector.broadcast %39 : vector<2x8x1xf32> to vector<2x8x8xf32>
    %41 = arith.subf %37, %40 : vector<2x8x8xf32>
    %42 = math.exp %41 : vector<2x8x8xf32>
    %cst_20 = arith.constant dense<0.000000e+00> : vector<2x8xf32>
    %43 = vector.multi_reduction <add>, %42, %cst_20 [2] : vector<2x8x8xf32> to vector<2x8xf32>
    %44 = vector.shape_cast %43 : vector<2x8xf32> to vector<2x8x1xf32>
    %45 = tpu.reciprocal %44 {approx = true} : vector<2x8x1xf32> -> vector<2x8x1xf32>
    %46 = vector.broadcast %45 : vector<2x8x1xf32> to vector<2x8x8xf32>
    %47 = arith.mulf %42, %46 : vector<2x8x8xf32>
    "tpu.trace_start"() <{level = 10 : i32, message = "bqk,bkd->bqd"}> : () -> ()
    %cst_21 = arith.constant dense<0.000000e+00> : vector<2x8x8xf32>
    %48 = tpu.matmul %47, %34, %cst_21 {dimension_numbers = #tpu.dot_dimension_numbers<[2], [1], [1], [2], [0, 0, 0, 1, 1, 2], [0], [0]>} : vector<2x8x8xf32>, vector<2x8x8xf32>, vector<2x8x8xf32> -> vector<2x8x8xf32>
    "tpu.trace_stop"() : () -> ()
    %49 = vector.shape_cast %48 : vector<2x8x8xf32> to vector<16x8xf32>
    %50 = vector.extract_strided_slice %22 {offsets = [0, 8], sizes = [16, 8], strides = [1, 1]} : vector<16x32xf32> to vector<16x8xf32>
    %51 = vector.shape_cast %50 : vector<16x8xf32> to vector<2x8x8xf32>
    %52 = vector.extract_strided_slice %23 {offsets = [0, 8], sizes = [16, 8], strides = [1, 1]} : vector<16x32xf32> to vector<16x8xf32>
    %53 = vector.shape_cast %52 : vector<16x8xf32> to vector<2x8x8xf32>
    %54 = vector.extract_strided_slice %24 {offsets = [0, 8], sizes = [16, 8], strides = [1, 1]} : vector<16x32xf32> to vector<16x8xf32>
    %55 = vector.shape_cast %54 : vector<16x8xf32> to vector<2x8x8xf32>
    "tpu.trace_start"() <{level = 10 : i32, message = "bqd,bkd->bqk"}> : () -> ()
    %cst_22 = arith.constant dense<0.000000e+00> : vector<2x8x8xf32>
    %56 = tpu.matmul %51, %53, %cst_22 {dimension_numbers = #tpu.dot_dimension_numbers<[2], [2], [1], [1], [0, 0, 0, 1, 1, 1], [0], [0]>} : vector<2x8x8xf32>, vector<2x8x8xf32>, vector<2x8x8xf32> -> vector<2x8x8xf32>
    "tpu.trace_stop"() : () -> ()
    %57 = vector.broadcast %21 : vector<1x8x8xf32> to vector<2x8x8xf32>
    %58 = arith.addf %56, %57 : vector<2x8x8xf32>
    %cst_23 = arith.constant dense<0xFF800000> : vector<2x8xf32>
    %59 = vector.multi_reduction <maximumf>, %58, %cst_23 [2] : vector<2x8x8xf32> to vector<2x8xf32>
    %60 = vector.shape_cast %59 : vector<2x8xf32> to vector<2x8x1xf32>
    %61 = vector.broadcast %60 : vector<2x8x1xf32> to vector<2x8x8xf32>
    %62 = arith.subf %58, %61 : vector<2x8x8xf32>
    %63 = math.exp %62 : vector<2x8x8xf32>
    %cst_24 = arith.constant dense<0.000000e+00> : vector<2x8xf32>
    %64 = vector.multi_reduction <add>, %63, %cst_24 [2] : vector<2x8x8xf32> to vector<2x8xf32>
    %65 = vector.shape_cast %64 : vector<2x8xf32> to vector<2x8x1xf32>
    %66 = tpu.reciprocal %65 {approx = true} : vector<2x8x1xf32> -> vector<2x8x1xf32>
    %67 = vector.broadcast %66 : vector<2x8x1xf32> to vector<2x8x8xf32>
    %68 = arith.mulf %63, %67 : vector<2x8x8xf32>
    "tpu.trace_start"() <{level = 10 : i32, message = "bqk,bkd->bqd"}> : () -> ()
    %cst_25 = arith.constant dense<0.000000e+00> : vector<2x8x8xf32>
    %69 = tpu.matmul %68, %55, %cst_25 {dimension_numbers = #tpu.dot_dimension_numbers<[2], [1], [1], [2], [0, 0, 0, 1, 1, 2], [0], [0]>} : vector<2x8x8xf32>, vector<2x8x8xf32>, vector<2x8x8xf32> -> vector<2x8x8xf32>
    "tpu.trace_stop"() : () -> ()
    %70 = vector.shape_cast %69 : vector<2x8x8xf32> to vector<16x8xf32>
    %71 = vector.extract_strided_slice %22 {offsets = [0, 16], sizes = [16, 8], strides = [1, 1]} : vector<16x32xf32> to vector<16x8xf32>
    %72 = vector.shape_cast %71 : vector<16x8xf32> to vector<2x8x8xf32>
    %73 = vector.extract_strided_slice %23 {offsets = [0, 16], sizes = [16, 8], strides = [1, 1]} : vector<16x32xf32> to vector<16x8xf32>
    %74 = vector.shape_cast %73 : vector<16x8xf32> to vector<2x8x8xf32>
    %75 = vector.extract_strided_slice %24 {offsets = [0, 16], sizes = [16, 8], strides = [1, 1]} : vector<16x32xf32> to vector<16x8xf32>
    %76 = vector.shape_cast %75 : vector<16x8xf32> to vector<2x8x8xf32>
    "tpu.trace_start"() <{level = 10 : i32, message = "bqd,bkd->bqk"}> : () -> ()
    %cst_26 = arith.constant dense<0.000000e+00> : vector<2x8x8xf32>
    %77 = tpu.matmul %72, %74, %cst_26 {dimension_numbers = #tpu.dot_dimension_numbers<[2], [2], [1], [1], [0, 0, 0, 1, 1, 1], [0], [0]>} : vector<2x8x8xf32>, vector<2x8x8xf32>, vector<2x8x8xf32> -> vector<2x8x8xf32>
    "tpu.trace_stop"() : () -> ()
    %78 = vector.broadcast %21 : vector<1x8x8xf32> to vector<2x8x8xf32>
    %79 = arith.addf %77, %78 : vector<2x8x8xf32>
    %cst_27 = arith.constant dense<0xFF800000> : vector<2x8xf32>
    %80 = vector.multi_reduction <maximumf>, %79, %cst_27 [2] : vector<2x8x8xf32> to vector<2x8xf32>
    %81 = vector.shape_cast %80 : vector<2x8xf32> to vector<2x8x1xf32>
    %82 = vector.broadcast %81 : vector<2x8x1xf32> to vector<2x8x8xf32>
    %83 = arith.subf %79, %82 : vector<2x8x8xf32>
    %84 = math.exp %83 : vector<2x8x8xf32>
    %cst_28 = arith.constant dense<0.000000e+00> : vector<2x8xf32>
    %85 = vector.multi_reduction <add>, %84, %cst_28 [2] : vector<2x8x8xf32> to vector<2x8xf32>
    %86 = vector.shape_cast %85 : vector<2x8xf32> to vector<2x8x1xf32>
    %87 = tpu.reciprocal %86 {approx = true} : vector<2x8x1xf32> -> vector<2x8x1xf32>
    %88 = vector.broadcast %87 : vector<2x8x1xf32> to vector<2x8x8xf32>
    %89 = arith.mulf %84, %88 : vector<2x8x8xf32>
    "tpu.trace_start"() <{level = 10 : i32, message = "bqk,bkd->bqd"}> : () -> ()
    %cst_29 = arith.constant dense<0.000000e+00> : vector<2x8x8xf32>
    %90 = tpu.matmul %89, %76, %cst_29 {dimension_numbers = #tpu.dot_dimension_numbers<[2], [1], [1], [2], [0, 0, 0, 1, 1, 2], [0], [0]>} : vector<2x8x8xf32>, vector<2x8x8xf32>, vector<2x8x8xf32> -> vector<2x8x8xf32>
    "tpu.trace_stop"() : () -> ()
    %91 = vector.shape_cast %90 : vector<2x8x8xf32> to vector<16x8xf32>
    %92 = vector.extract_strided_slice %22 {offsets = [0, 24], sizes = [16, 8], strides = [1, 1]} : vector<16x32xf32> to vector<16x8xf32>
    %93 = vector.shape_cast %92 : vector<16x8xf32> to vector<2x8x8xf32>
    %94 = vector.extract_strided_slice %23 {offsets = [0, 24], sizes = [16, 8], strides = [1, 1]} : vector<16x32xf32> to vector<16x8xf32>
    %95 = vector.shape_cast %94 : vector<16x8xf32> to vector<2x8x8xf32>
    %96 = vector.extract_strided_slice %24 {offsets = [0, 24], sizes = [16, 8], strides = [1, 1]} : vector<16x32xf32> to vector<16x8xf32>
    %97 = vector.shape_cast %96 : vector<16x8xf32> to vector<2x8x8xf32>
    "tpu.trace_start"() <{level = 10 : i32, message = "bqd,bkd->bqk"}> : () -> ()
    %cst_30 = arith.constant dense<0.000000e+00> : vector<2x8x8xf32>
    %98 = tpu.matmul %93, %95, %cst_30 {dimension_numbers = #tpu.dot_dimension_numbers<[2], [2], [1], [1], [0, 0, 0, 1, 1, 1], [0], [0]>} : vector<2x8x8xf32>, vector<2x8x8xf32>, vector<2x8x8xf32> -> vector<2x8x8xf32>
    "tpu.trace_stop"() : () -> ()
    %99 = vector.broadcast %21 : vector<1x8x8xf32> to vector<2x8x8xf32>
    %100 = arith.addf %98, %99 : vector<2x8x8xf32>
    %cst_31 = arith.constant dense<0xFF800000> : vector<2x8xf32>
    %101 = vector.multi_reduction <maximumf>, %100, %cst_31 [2] : vector<2x8x8xf32> to vector<2x8xf32>
    %102 = vector.shape_cast %101 : vector<2x8xf32> to vector<2x8x1xf32>
    %103 = vector.broadcast %102 : vector<2x8x1xf32> to vector<2x8x8xf32>
    %104 = arith.subf %100, %103 : vector<2x8x8xf32>
    %105 = math.exp %104 : vector<2x8x8xf32>
    %cst_32 = arith.constant dense<0.000000e+00> : vector<2x8xf32>
    %106 = vector.multi_reduction <add>, %105, %cst_32 [2] : vector<2x8x8xf32> to vector<2x8xf32>
    %107 = vector.shape_cast %106 : vector<2x8xf32> to vector<2x8x1xf32>
    %108 = tpu.reciprocal %107 {approx = true} : vector<2x8x1xf32> -> vector<2x8x1xf32>
    %109 = vector.broadcast %108 : vector<2x8x1xf32> to vector<2x8x8xf32>
    %110 = arith.mulf %105, %109 : vector<2x8x8xf32>
    "tpu.trace_start"() <{level = 10 : i32, message = "bqk,bkd->bqd"}> : () -> ()
    %cst_33 = arith.constant dense<0.000000e+00> : vector<2x8x8xf32>
    %111 = tpu.matmul %110, %97, %cst_33 {dimension_numbers = #tpu.dot_dimension_numbers<[2], [1], [1], [2], [0, 0, 0, 1, 1, 2], [0], [0]>} : vector<2x8x8xf32>, vector<2x8x8xf32>, vector<2x8x8xf32> -> vector<2x8x8xf32>
    "tpu.trace_stop"() : () -> ()
    %112 = vector.shape_cast %111 : vector<2x8x8xf32> to vector<16x8xf32>
    %113 = tpu.concatenate %49, %70, %91, %112 in 1 : vector<16x8xf32>, vector<16x8xf32>, vector<16x8xf32>, vector<16x8xf32> -> vector<16x32xf32>
    %cst_34 = arith.constant dense<0.000000e+00> : vector<16x32xf32>
    %114 = tpu.matmul %113, %26, %cst_34 {dimension_numbers = #tpu.dot_dimension_numbers<[1], [0], [0], [1], [0, 0, 1, 1], [], []>} : vector<16x32xf32>, vector<32x32xf32>, vector<16x32xf32> -> vector<16x32xf32>
    %115 = vector.broadcast %28 : vector<1x32xf32> to vector<16x32xf32>
    %116 = arith.addf %114, %115 : vector<16x32xf32>
    %117 = arith.addf %116, %3 : vector<16x32xf32>
    %c0_35 = arith.constant 0 : index
    %c0_36 = arith.constant 0 : index
    %c128 = arith.constant 128 : index
    %118 = vector.load %arg6[%c0_35, %c0_36, %c128] : memref<1x1x544xf32, #tpu.memory_space<vmem>>, vector<1x1x32xf32>
    %119 = vector.shape_cast %118 : vector<1x1x32xf32> to vector<1x32xf32>
    %c0_37 = arith.constant 0 : index
    %c0_38 = arith.constant 0 : index
    %c160 = arith.constant 160 : index
    %120 = vector.load %arg6[%c0_37, %c0_38, %c160] : memref<1x1x544xf32, #tpu.memory_space<vmem>>, vector<1x1x32xf32>
    %121 = vector.shape_cast %120 : vector<1x1x32xf32> to vector<1x32xf32>
    %cst_39 = arith.constant dense<0.000000e+00> : vector<16xf32>
    %122 = vector.multi_reduction <add>, %117, %cst_39 [1] : vector<16x32xf32> to vector<16xf32>
    %123 = vector.shape_cast %122 : vector<16xf32> to vector<16x1xf32>
    %cst_40 = arith.constant 3.200000e+01 : f32
    %124 = vector.broadcast %cst_40 : f32 to vector<16x1xf32>
    %125 = arith.divf %123, %124 : vector<16x1xf32>
    %126 = vector.broadcast %125 : vector<16x1xf32> to vector<16x32xf32>
    %127 = arith.subf %117, %126 : vector<16x32xf32>
    %128 = arith.mulf %127, %127 : vector<16x32xf32>
    %cst_41 = arith.constant dense<0.000000e+00> : vector<16xf32>
    %129 = vector.multi_reduction <add>, %128, %cst_41 [1] : vector<16x32xf32> to vector<16xf32>
    %130 = vector.shape_cast %129 : vector<16xf32> to vector<16x1xf32>
    %cst_42 = arith.constant 3.200000e+01 : f32
    %131 = vector.broadcast %cst_42 : f32 to vector<16x1xf32>
    %132 = arith.divf %130, %131 : vector<16x1xf32>
    %133 = vector.broadcast %125 : vector<16x1xf32> to vector<16x32xf32>
    %134 = arith.subf %117, %133 : vector<16x32xf32>
    %cst_43 = arith.constant 9.99999974E-6 : f32
    %135 = vector.broadcast %cst_43 : f32 to vector<16x1xf32>
    %136 = arith.addf %132, %135 : vector<16x1xf32>
    %137 = math.rsqrt %136 : vector<16x1xf32>
    %138 = vector.broadcast %137 : vector<16x1xf32> to vector<16x32xf32>
    %139 = arith.mulf %134, %138 : vector<16x32xf32>
    %140 = vector.broadcast %119 : vector<1x32xf32> to vector<16x32xf32>
    %141 = arith.mulf %139, %140 : vector<16x32xf32>
    %142 = vector.broadcast %121 : vector<1x32xf32> to vector<16x32xf32>
    %143 = arith.addf %141, %142 : vector<16x32xf32>
    %c0_44 = arith.constant 0 : index
    %c0_45 = arith.constant 0 : index
    %144 = vector.load %arg2[%c0_44, %c0_45] : memref<32x32xf32, #tpu.memory_space<vmem>>, vector<32x32xf32>
    %c0_46 = arith.constant 0 : index
    %c0_47 = arith.constant 0 : index
    %c128_48 = arith.constant 128 : index
    %145 = vector.load %arg4[%c0_46, %c0_47, %c128_48] : memref<1x32x320xf32, #tpu.memory_space<vmem>>, vector<1x32x32xf32>
    %146 = vector.shape_cast %145 : vector<1x32x32xf32> to vector<32x32xf32>
    %cst_49 = arith.constant dense<0.000000e+00> : vector<16x32xf32>
    %147 = tpu.matmul %143, %146, %cst_49 {dimension_numbers = #tpu.dot_dimension_numbers<[1], [0], [0], [1], [0, 0, 1, 1], [], []>} : vector<16x32xf32>, vector<32x32xf32>, vector<16x32xf32> -> vector<16x32xf32>
    %c0_50 = arith.constant 0 : index
    %c0_51 = arith.constant 0 : index
    %c192 = arith.constant 192 : index
    %148 = vector.load %arg6[%c0_50, %c0_51, %c192] : memref<1x1x544xf32, #tpu.memory_space<vmem>>, vector<1x1x32xf32>
    %149 = vector.shape_cast %148 : vector<1x1x32xf32> to vector<1x32xf32>
    %150 = vector.broadcast %149 : vector<1x32xf32> to vector<16x32xf32>
    %151 = arith.addf %147, %150 : vector<16x32xf32>
    %c0_52 = arith.constant 0 : index
    %c0_53 = arith.constant 0 : index
    %c160_54 = arith.constant 160 : index
    %152 = vector.load %arg4[%c0_52, %c0_53, %c160_54] : memref<1x32x320xf32, #tpu.memory_space<vmem>>, vector<1x32x64xf32>
    %153 = vector.shape_cast %152 : vector<1x32x64xf32> to vector<32x64xf32>
    %cst_55 = arith.constant dense<0.000000e+00> : vector<32x64xf32>
    %154 = tpu.matmul %144, %153, %cst_55 {dimension_numbers = #tpu.dot_dimension_numbers<[1], [0], [0], [1], [0, 0, 1, 1], [], []>} : vector<32x32xf32>, vector<32x64xf32>, vector<32x64xf32> -> vector<32x64xf32>
    %c0_56 = arith.constant 0 : index
    %c0_57 = arith.constant 0 : index
    %c224 = arith.constant 224 : index
    %155 = vector.load %arg6[%c0_56, %c0_57, %c224] : memref<1x1x544xf32, #tpu.memory_space<vmem>>, vector<1x1x64xf32>
    %156 = vector.shape_cast %155 : vector<1x1x64xf32> to vector<1x64xf32>
    %157 = vector.broadcast %156 : vector<1x64xf32> to vector<32x64xf32>
    %158 = arith.addf %154, %157 : vector<32x64xf32>
    %c0_58 = arith.constant 0 : index
    %c0_59 = arith.constant 0 : index
    %c0_60 = arith.constant 0 : index
    %159 = vector.load %arg11[%c0_58, %c0_59, %c0_60] : memref<1x32x64xf32, #tpu.memory_space<vmem>>, vector<1x32x64xf32>
    %160 = vector.shape_cast %159 : vector<1x32x64xf32> to vector<32x64xf32>
    %161 = vector.shape_cast %158 : vector<32x64xf32> to vector<1x32x64xf32>
    tpu.vector_store %arg11[%c0_58, %c0_59, %c0_60], %161 {strides = array<i32>} : memref<1x32x64xf32, #tpu.memory_space<vmem>>, vector<1x32x64xf32>,
    %c0_61 = arith.constant 0 : index
    %c0_62 = arith.constant 0 : index
    %c0_63 = arith.constant 0 : index
    %162 = vector.load %arg3[%c0_61, %c0_62, %c0_63] : memref<2x1x16xf32, #tpu.memory_space<vmem>>, vector<2x1x16xf32>
    %163 = vector.extract_strided_slice %158 {offsets = [0, 0], sizes = [32, 32], strides = [1, 1]} : vector<32x64xf32> to vector<32x32xf32>
    %164 = vector.extract_strided_slice %158 {offsets = [0, 32], sizes = [32, 32], strides = [1, 1]} : vector<32x64xf32> to vector<32x32xf32>
    %c0_64 = arith.constant 0 : index
    %c0_65 = arith.constant 0 : index
    %c224_66 = arith.constant 224 : index
    %165 = vector.load %arg4[%c0_64, %c0_65, %c224_66] : memref<1x32x320xf32, #tpu.memory_space<vmem>>, vector<1x32x32xf32>
    %166 = vector.shape_cast %165 : vector<1x32x32xf32> to vector<32x32xf32>
    %c0_67 = arith.constant 0 : index
    %c0_68 = arith.constant 0 : index
    %c288 = arith.constant 288 : index
    %167 = vector.load %arg6[%c0_67, %c0_68, %c288] : memref<1x1x544xf32, #tpu.memory_space<vmem>>, vector<1x1x32xf32>
    %168 = vector.shape_cast %167 : vector<1x1x32xf32> to vector<1x32xf32>
    %169 = vector.extract_strided_slice %151 {offsets = [0, 0], sizes = [16, 8], strides = [1, 1]} : vector<16x32xf32> to vector<16x8xf32>
    %170 = vector.shape_cast %169 : vector<16x8xf32> to vector<2x8x8xf32>
    %171 = vector.extract_strided_slice %163 {offsets = [0, 0], sizes = [32, 8], strides = [1, 1]} : vector<32x32xf32> to vector<32x8xf32>
    %172 = vector.shape_cast %171 : vector<32x8xf32> to vector<2x16x8xf32>
    %173 = vector.extract_strided_slice %164 {offsets = [0, 0], sizes = [32, 8], strides = [1, 1]} : vector<32x32xf32> to vector<32x8xf32>
    %174 = vector.shape_cast %173 : vector<32x8xf32> to vector<2x16x8xf32>
    "tpu.trace_start"() <{level = 10 : i32, message = "bqd,bkd->bqk"}> : () -> ()
    %cst_69 = arith.constant dense<0.000000e+00> : vector<2x8x16xf32>
    %175 = tpu.matmul %170, %172, %cst_69 {dimension_numbers = #tpu.dot_dimension_numbers<[2], [2], [1], [1], [0, 0, 0, 1, 1, 1], [0], [0]>} : vector<2x8x8xf32>, vector<2x16x8xf32>, vector<2x8x16xf32> -> vector<2x8x16xf32>
    "tpu.trace_stop"() : () -> ()
    %176 = vector.broadcast %162 : vector<2x1x16xf32> to vector<2x8x16xf32>
    %177 = arith.addf %175, %176 : vector<2x8x16xf32>
    %cst_70 = arith.constant dense<0xFF800000> : vector<2x8xf32>
    %178 = vector.multi_reduction <maximumf>, %177, %cst_70 [2] : vector<2x8x16xf32> to vector<2x8xf32>
    %179 = vector.shape_cast %178 : vector<2x8xf32> to vector<2x8x1xf32>
    %180 = vector.broadcast %179 : vector<2x8x1xf32> to vector<2x8x16xf32>
    %181 = arith.subf %177, %180 : vector<2x8x16xf32>
    %182 = math.exp %181 : vector<2x8x16xf32>
    %cst_71 = arith.constant dense<0.000000e+00> : vector<2x8xf32>
    %183 = vector.multi_reduction <add>, %182, %cst_71 [2] : vector<2x8x16xf32> to vector<2x8xf32>
    %184 = vector.shape_cast %183 : vector<2x8xf32> to vector<2x8x1xf32>
    %185 = tpu.reciprocal %184 {approx = true} : vector<2x8x1xf32> -> vector<2x8x1xf32>
    %186 = vector.broadcast %185 : vector<2x8x1xf32> to vector<2x8x16xf32>
    %187 = arith.mulf %182, %186 : vector<2x8x16xf32>
    "tpu.trace_start"() <{level = 10 : i32, message = "bqk,bkd->bqd"}> : () -> ()
    %cst_72 = arith.constant dense<0.000000e+00> : vector<2x8x8xf32>
    %188 = tpu.matmul %187, %174, %cst_72 {dimension_numbers = #tpu.dot_dimension_numbers<[2], [1], [1], [2], [0, 0, 0, 1, 1, 2], [0], [0]>} : vector<2x8x16xf32>, vector<2x16x8xf32>, vector<2x8x8xf32> -> vector<2x8x8xf32>
    "tpu.trace_stop"() : () -> ()
    %189 = vector.shape_cast %188 : vector<2x8x8xf32> to vector<16x8xf32>
    %190 = vector.extract_strided_slice %151 {offsets = [0, 8], sizes = [16, 8], strides = [1, 1]} : vector<16x32xf32> to vector<16x8xf32>
    %191 = vector.shape_cast %190 : vector<16x8xf32> to vector<2x8x8xf32>
    %192 = vector.extract_strided_slice %163 {offsets = [0, 8], sizes = [32, 8], strides = [1, 1]} : vector<32x32xf32> to vector<32x8xf32>
    %193 = vector.shape_cast %192 : vector<32x8xf32> to vector<2x16x8xf32>
    %194 = vector.extract_strided_slice %164 {offsets = [0, 8], sizes = [32, 8], strides = [1, 1]} : vector<32x32xf32> to vector<32x8xf32>
    %195 = vector.shape_cast %194 : vector<32x8xf32> to vector<2x16x8xf32>
    "tpu.trace_start"() <{level = 10 : i32, message = "bqd,bkd->bqk"}> : () -> ()
    %cst_73 = arith.constant dense<0.000000e+00> : vector<2x8x16xf32>
    %196 = tpu.matmul %191, %193, %cst_73 {dimension_numbers = #tpu.dot_dimension_numbers<[2], [2], [1], [1], [0, 0, 0, 1, 1, 1], [0], [0]>} : vector<2x8x8xf32>, vector<2x16x8xf32>, vector<2x8x16xf32> -> vector<2x8x16xf32>
    "tpu.trace_stop"() : () -> ()
    %197 = vector.broadcast %162 : vector<2x1x16xf32> to vector<2x8x16xf32>
    %198 = arith.addf %196, %197 : vector<2x8x16xf32>
    %cst_74 = arith.constant dense<0xFF800000> : vector<2x8xf32>
    %199 = vector.multi_reduction <maximumf>, %198, %cst_74 [2] : vector<2x8x16xf32> to vector<2x8xf32>
    %200 = vector.shape_cast %199 : vector<2x8xf32> to vector<2x8x1xf32>
    %201 = vector.broadcast %200 : vector<2x8x1xf32> to vector<2x8x16xf32>
    %202 = arith.subf %198, %201 : vector<2x8x16xf32>
    %203 = math.exp %202 : vector<2x8x16xf32>
    %cst_75 = arith.constant dense<0.000000e+00> : vector<2x8xf32>
    %204 = vector.multi_reduction <add>, %203, %cst_75 [2] : vector<2x8x16xf32> to vector<2x8xf32>
    %205 = vector.shape_cast %204 : vector<2x8xf32> to vector<2x8x1xf32>
    %206 = tpu.reciprocal %205 {approx = true} : vector<2x8x1xf32> -> vector<2x8x1xf32>
    %207 = vector.broadcast %206 : vector<2x8x1xf32> to vector<2x8x16xf32>
    %208 = arith.mulf %203, %207 : vector<2x8x16xf32>
    "tpu.trace_start"() <{level = 10 : i32, message = "bqk,bkd->bqd"}> : () -> ()
    %cst_76 = arith.constant dense<0.000000e+00> : vector<2x8x8xf32>
    %209 = tpu.matmul %208, %195, %cst_76 {dimension_numbers = #tpu.dot_dimension_numbers<[2], [1], [1], [2], [0, 0, 0, 1, 1, 2], [0], [0]>} : vector<2x8x16xf32>, vector<2x16x8xf32>, vector<2x8x8xf32> -> vector<2x8x8xf32>
    "tpu.trace_stop"() : () -> ()
    %210 = vector.shape_cast %209 : vector<2x8x8xf32> to vector<16x8xf32>
    %211 = vector.extract_strided_slice %151 {offsets = [0, 16], sizes = [16, 8], strides = [1, 1]} : vector<16x32xf32> to vector<16x8xf32>
    %212 = vector.shape_cast %211 : vector<16x8xf32> to vector<2x8x8xf32>
    %213 = vector.extract_strided_slice %163 {offsets = [0, 16], sizes = [32, 8], strides = [1, 1]} : vector<32x32xf32> to vector<32x8xf32>
    %214 = vector.shape_cast %213 : vector<32x8xf32> to vector<2x16x8xf32>
    %215 = vector.extract_strided_slice %164 {offsets = [0, 16], sizes = [32, 8], strides = [1, 1]} : vector<32x32xf32> to vector<32x8xf32>
    %216 = vector.shape_cast %215 : vector<32x8xf32> to vector<2x16x8xf32>
    "tpu.trace_start"() <{level = 10 : i32, message = "bqd,bkd->bqk"}> : () -> ()
    %cst_77 = arith.constant dense<0.000000e+00> : vector<2x8x16xf32>
    %217 = tpu.matmul %212, %214, %cst_77 {dimension_numbers = #tpu.dot_dimension_numbers<[2], [2], [1], [1], [0, 0, 0, 1, 1, 1], [0], [0]>} : vector<2x8x8xf32>, vector<2x16x8xf32>, vector<2x8x16xf32> -> vector<2x8x16xf32>
    "tpu.trace_stop"() : () -> ()
    %218 = vector.broadcast %162 : vector<2x1x16xf32> to vector<2x8x16xf32>
    %219 = arith.addf %217, %218 : vector<2x8x16xf32>
    %cst_78 = arith.constant dense<0xFF800000> : vector<2x8xf32>
    %220 = vector.multi_reduction <maximumf>, %219, %cst_78 [2] : vector<2x8x16xf32> to vector<2x8xf32>
    %221 = vector.shape_cast %220 : vector<2x8xf32> to vector<2x8x1xf32>
    %222 = vector.broadcast %221 : vector<2x8x1xf32> to vector<2x8x16xf32>
    %223 = arith.subf %219, %222 : vector<2x8x16xf32>
    %224 = math.exp %223 : vector<2x8x16xf32>
    %cst_79 = arith.constant dense<0.000000e+00> : vector<2x8xf32>
    %225 = vector.multi_reduction <add>, %224, %cst_79 [2] : vector<2x8x16xf32> to vector<2x8xf32>
    %226 = vector.shape_cast %225 : vector<2x8xf32> to vector<2x8x1xf32>
    %227 = tpu.reciprocal %226 {approx = true} : vector<2x8x1xf32> -> vector<2x8x1xf32>
    %228 = vector.broadcast %227 : vector<2x8x1xf32> to vector<2x8x16xf32>
    %229 = arith.mulf %224, %228 : vector<2x8x16xf32>
    "tpu.trace_start"() <{level = 10 : i32, message = "bqk,bkd->bqd"}> : () -> ()
    %cst_80 = arith.constant dense<0.000000e+00> : vector<2x8x8xf32>
    %230 = tpu.matmul %229, %216, %cst_80 {dimension_numbers = #tpu.dot_dimension_numbers<[2], [1], [1], [2], [0, 0, 0, 1, 1, 2], [0], [0]>} : vector<2x8x16xf32>, vector<2x16x8xf32>, vector<2x8x8xf32> -> vector<2x8x8xf32>
    "tpu.trace_stop"() : () -> ()
    %231 = vector.shape_cast %230 : vector<2x8x8xf32> to vector<16x8xf32>
    %232 = vector.extract_strided_slice %151 {offsets = [0, 24], sizes = [16, 8], strides = [1, 1]} : vector<16x32xf32> to vector<16x8xf32>
    %233 = vector.shape_cast %232 : vector<16x8xf32> to vector<2x8x8xf32>
    %234 = vector.extract_strided_slice %163 {offsets = [0, 24], sizes = [32, 8], strides = [1, 1]} : vector<32x32xf32> to vector<32x8xf32>
    %235 = vector.shape_cast %234 : vector<32x8xf32> to vector<2x16x8xf32>
    %236 = vector.extract_strided_slice %164 {offsets = [0, 24], sizes = [32, 8], strides = [1, 1]} : vector<32x32xf32> to vector<32x8xf32>
    %237 = vector.shape_cast %236 : vector<32x8xf32> to vector<2x16x8xf32>
    "tpu.trace_start"() <{level = 10 : i32, message = "bqd,bkd->bqk"}> : () -> ()
    %cst_81 = arith.constant dense<0.000000e+00> : vector<2x8x16xf32>
    %238 = tpu.matmul %233, %235, %cst_81 {dimension_numbers = #tpu.dot_dimension_numbers<[2], [2], [1], [1], [0, 0, 0, 1, 1, 1], [0], [0]>} : vector<2x8x8xf32>, vector<2x16x8xf32>, vector<2x8x16xf32> -> vector<2x8x16xf32>
    "tpu.trace_stop"() : () -> ()
    %239 = vector.broadcast %162 : vector<2x1x16xf32> to vector<2x8x16xf32>
    %240 = arith.addf %238, %239 : vector<2x8x16xf32>
    %cst_82 = arith.constant dense<0xFF800000> : vector<2x8xf32>
    %241 = vector.multi_reduction <maximumf>, %240, %cst_82 [2] : vector<2x8x16xf32> to vector<2x8xf32>
    %242 = vector.shape_cast %241 : vector<2x8xf32> to vector<2x8x1xf32>
    %243 = vector.broadcast %242 : vector<2x8x1xf32> to vector<2x8x16xf32>
    %244 = arith.subf %240, %243 : vector<2x8x16xf32>
    %245 = math.exp %244 : vector<2x8x16xf32>
    %cst_83 = arith.constant dense<0.000000e+00> : vector<2x8xf32>
    %246 = vector.multi_reduction <add>, %245, %cst_83 [2] : vector<2x8x16xf32> to vector<2x8xf32>
    %247 = vector.shape_cast %246 : vector<2x8xf32> to vector<2x8x1xf32>
    %248 = tpu.reciprocal %247 {approx = true} : vector<2x8x1xf32> -> vector<2x8x1xf32>
    %249 = vector.broadcast %248 : vector<2x8x1xf32> to vector<2x8x16xf32>
    %250 = arith.mulf %245, %249 : vector<2x8x16xf32>
    "tpu.trace_start"() <{level = 10 : i32, message = "bqk,bkd->bqd"}> : () -> ()
    %cst_84 = arith.constant dense<0.000000e+00> : vector<2x8x8xf32>
    %251 = tpu.matmul %250, %237, %cst_84 {dimension_numbers = #tpu.dot_dimension_numbers<[2], [1], [1], [2], [0, 0, 0, 1, 1, 2], [0], [0]>} : vector<2x8x16xf32>, vector<2x16x8xf32>, vector<2x8x8xf32> -> vector<2x8x8xf32>
    "tpu.trace_stop"() : () -> ()
    %252 = vector.shape_cast %251 : vector<2x8x8xf32> to vector<16x8xf32>
    %253 = tpu.concatenate %189, %210, %231, %252 in 1 : vector<16x8xf32>, vector<16x8xf32>, vector<16x8xf32>, vector<16x8xf32> -> vector<16x32xf32>
    %cst_85 = arith.constant dense<0.000000e+00> : vector<16x32xf32>
    %254 = tpu.matmul %253, %166, %cst_85 {dimension_numbers = #tpu.dot_dimension_numbers<[1], [0], [0], [1], [0, 0, 1, 1], [], []>} : vector<16x32xf32>, vector<32x32xf32>, vector<16x32xf32> -> vector<16x32xf32>
    %255 = vector.broadcast %168 : vector<1x32xf32> to vector<16x32xf32>
    %256 = arith.addf %254, %255 : vector<16x32xf32>
    %257 = arith.addf %256, %143 : vector<16x32xf32>
    %c0_86 = arith.constant 0 : index
    %c0_87 = arith.constant 0 : index
    %c320 = arith.constant 320 : index
    %258 = vector.load %arg6[%c0_86, %c0_87, %c320] : memref<1x1x544xf32, #tpu.memory_space<vmem>>, vector<1x1x32xf32>
    %259 = vector.shape_cast %258 : vector<1x1x32xf32> to vector<1x32xf32>
    %c0_88 = arith.constant 0 : index
    %c0_89 = arith.constant 0 : index
    %c352 = arith.constant 352 : index
    %260 = vector.load %arg6[%c0_88, %c0_89, %c352] : memref<1x1x544xf32, #tpu.memory_space<vmem>>, vector<1x1x32xf32>
    %261 = vector.shape_cast %260 : vector<1x1x32xf32> to vector<1x32xf32>
    %cst_90 = arith.constant dense<0.000000e+00> : vector<16xf32>
    %262 = vector.multi_reduction <add>, %257, %cst_90 [1] : vector<16x32xf32> to vector<16xf32>
    %263 = vector.shape_cast %262 : vector<16xf32> to vector<16x1xf32>
    %cst_91 = arith.constant 3.200000e+01 : f32
    %264 = vector.broadcast %cst_91 : f32 to vector<16x1xf32>
    %265 = arith.divf %263, %264 : vector<16x1xf32>
    %266 = vector.broadcast %265 : vector<16x1xf32> to vector<16x32xf32>
    %267 = arith.subf %257, %266 : vector<16x32xf32>
    %268 = arith.mulf %267, %267 : vector<16x32xf32>
    %cst_92 = arith.constant dense<0.000000e+00> : vector<16xf32>
    %269 = vector.multi_reduction <add>, %268, %cst_92 [1] : vector<16x32xf32> to vector<16xf32>
    %270 = vector.shape_cast %269 : vector<16xf32> to vector<16x1xf32>
    %cst_93 = arith.constant 3.200000e+01 : f32
    %271 = vector.broadcast %cst_93 : f32 to vector<16x1xf32>
    %272 = arith.divf %270, %271 : vector<16x1xf32>
    %273 = vector.broadcast %265 : vector<16x1xf32> to vector<16x32xf32>
    %274 = arith.subf %257, %273 : vector<16x32xf32>
    %cst_94 = arith.constant 9.99999974E-6 : f32
    %275 = vector.broadcast %cst_94 : f32 to vector<16x1xf32>
    %276 = arith.addf %272, %275 : vector<16x1xf32>
    %277 = math.rsqrt %276 : vector<16x1xf32>
    %278 = vector.broadcast %277 : vector<16x1xf32> to vector<16x32xf32>
    %279 = arith.mulf %274, %278 : vector<16x32xf32>
    %280 = vector.broadcast %259 : vector<1x32xf32> to vector<16x32xf32>
    %281 = arith.mulf %279, %280 : vector<16x32xf32>
    %282 = vector.broadcast %261 : vector<1x32xf32> to vector<16x32xf32>
    %283 = arith.addf %281, %282 : vector<16x32xf32>
    %c0_95 = arith.constant 0 : index
    %c0_96 = arith.constant 0 : index
    %c256 = arith.constant 256 : index
    %284 = vector.load %arg4[%c0_95, %c0_96, %c256] : memref<1x32x320xf32, #tpu.memory_space<vmem>>, vector<1x32x64xf32>
    %285 = vector.shape_cast %284 : vector<1x32x64xf32> to vector<32x64xf32>
    %cst_97 = arith.constant dense<0.000000e+00> : vector<16x64xf32>
    %286 = tpu.matmul %283, %285, %cst_97 {dimension_numbers = #tpu.dot_dimension_numbers<[1], [0], [0], [1], [0, 0, 1, 1], [], []>} : vector<16x32xf32>, vector<32x64xf32>, vector<16x64xf32> -> vector<16x64xf32>
    %c0_98 = arith.constant 0 : index
    %c0_99 = arith.constant 0 : index
    %c384 = arith.constant 384 : index
    %287 = vector.load %arg6[%c0_98, %c0_99, %c384] : memref<1x1x544xf32, #tpu.memory_space<vmem>>, vector<1x1x64xf32>
    %288 = vector.shape_cast %287 : vector<1x1x64xf32> to vector<1x64xf32>
    %289 = vector.broadcast %288 : vector<1x64xf32> to vector<16x64xf32>
    %290 = arith.addf %286, %289 : vector<16x64xf32>
    %291 = arith.negf %290 : vector<16x64xf32>
    %292 = math.exp %291 : vector<16x64xf32>
    %cst_100 = arith.constant 1.000000e+00 : f32
    %293 = vector.broadcast %cst_100 : f32 to vector<16x64xf32>
    %294 = arith.addf %293, %292 : vector<16x64xf32>
    %295 = arith.divf %293, %294 : vector<16x64xf32>
    %296 = arith.mulf %290, %295 : vector<16x64xf32>
    %c0_101 = arith.constant 0 : index
    %c0_102 = arith.constant 0 : index
    %c0_103 = arith.constant 0 : index
    %297 = vector.load %arg5[%c0_101, %c0_102, %c0_103] : memref<1x64x32xf32, #tpu.memory_space<vmem>>, vector<1x64x32xf32>
    %298 = vector.shape_cast %297 : vector<1x64x32xf32> to vector<64x32xf32>
    %cst_104 = arith.constant dense<0.000000e+00> : vector<16x32xf32>
    %299 = tpu.matmul %296, %298, %cst_104 {dimension_numbers = #tpu.dot_dimension_numbers<[1], [0], [0], [1], [0, 0, 1, 1], [], []>} : vector<16x64xf32>, vector<64x32xf32>, vector<16x32xf32> -> vector<16x32xf32>
    %c0_105 = arith.constant 0 : index
    %c0_106 = arith.constant 0 : index
    %c448 = arith.constant 448 : index
    %300 = vector.load %arg6[%c0_105, %c0_106, %c448] : memref<1x1x544xf32, #tpu.memory_space<vmem>>, vector<1x1x32xf32>
    %301 = vector.shape_cast %300 : vector<1x1x32xf32> to vector<1x32xf32>
    %302 = vector.broadcast %301 : vector<1x32xf32> to vector<16x32xf32>
    %303 = arith.addf %299, %302 : vector<16x32xf32>
    %304 = arith.addf %303, %283 : vector<16x32xf32>
    %c0_107 = arith.constant 0 : index
    %c0_108 = arith.constant 0 : index
    %c480 = arith.constant 480 : index
    %305 = vector.load %arg6[%c0_107, %c0_108, %c480] : memref<1x1x544xf32, #tpu.memory_space<vmem>>, vector<1x1x32xf32>
    %306 = vector.shape_cast %305 : vector<1x1x32xf32> to vector<1x32xf32>
    %c0_109 = arith.constant 0 : index
    %c0_110 = arith.constant 0 : index
    %c512 = arith.constant 512 : index
    %307 = vector.load %arg6[%c0_109, %c0_110, %c512] : memref<1x1x544xf32, #tpu.memory_space<vmem>>, vector<1x1x32xf32>
    %308 = vector.shape_cast %307 : vector<1x1x32xf32> to vector<1x32xf32>
    %cst_111 = arith.constant dense<0.000000e+00> : vector<16xf32>
    %309 = vector.multi_reduction <add>, %304, %cst_111 [1] : vector<16x32xf32> to vector<16xf32>
    %310 = vector.shape_cast %309 : vector<16xf32> to vector<16x1xf32>
    %cst_112 = arith.constant 3.200000e+01 : f32
    %311 = vector.broadcast %cst_112 : f32 to vector<16x1xf32>
    %312 = arith.divf %310, %311 : vector<16x1xf32>
    %313 = vector.broadcast %312 : vector<16x1xf32> to vector<16x32xf32>
    %314 = arith.subf %304, %313 : vector<16x32xf32>
    %315 = arith.mulf %314, %314 : vector<16x32xf32>
    %cst_113 = arith.constant dense<0.000000e+00> : vector<16xf32>
    %316 = vector.multi_reduction <add>, %315, %cst_113 [1] : vector<16x32xf32> to vector<16xf32>
    %317 = vector.shape_cast %316 : vector<16xf32> to vector<16x1xf32>
    %cst_114 = arith.constant 3.200000e+01 : f32
    %318 = vector.broadcast %cst_114 : f32 to vector<16x1xf32>
    %319 = arith.divf %317, %318 : vector<16x1xf32>
    %320 = vector.broadcast %312 : vector<16x1xf32> to vector<16x32xf32>
    %321 = arith.subf %304, %320 : vector<16x32xf32>
    %cst_115 = arith.constant 9.99999974E-6 : f32
    %322 = vector.broadcast %cst_115 : f32 to vector<16x1xf32>
    %323 = arith.addf %319, %322 : vector<16x1xf32>
    %324 = math.rsqrt %323 : vector<16x1xf32>
    %325 = vector.broadcast %324 : vector<16x1xf32> to vector<16x32xf32>
    %326 = arith.mulf %321, %325 : vector<16x32xf32>
    %327 = vector.broadcast %306 : vector<1x32xf32> to vector<16x32xf32>
    %328 = arith.mulf %326, %327 : vector<16x32xf32>
    %329 = vector.broadcast %308 : vector<1x32xf32> to vector<16x32xf32>
    %330 = arith.addf %328, %329 : vector<16x32xf32>
    %c0_116 = arith.constant 0 : index
    %c0_117 = arith.constant 0 : index
    %331 = vector.load %arg12[%c0_116, %c0_117] : memref<16x32xf32, #tpu.memory_space<vmem>>, vector<16x32xf32>
    tpu.vector_store %arg12[%c0_116, %c0_117], %330 {strides = array<i32>} : memref<16x32xf32, #tpu.memory_space<vmem>>, vector<16x32xf32>,
    %c1_i32 = arith.constant 1 : i32
    %332 = arith.cmpi eq, %arg0, %c1_i32 : i32
    %333 = arith.extui %332 : i1 to i32
    %c0_i32_118 = arith.constant 0 : i32
    %334 = arith.cmpi ne, %333, %c0_i32_118 : i32
    scf.if %334 {
      %c0_119 = arith.constant 0 : index
      %c0_120 = arith.constant 0 : index
      %335 = vector.load %arg7[%c0_119, %c0_120] : memref<32x128xf32, #tpu.memory_space<vmem>>, vector<32x128xf32>
      %cst_121 = arith.constant dense<0.000000e+00> : vector<16x128xf32>
      %336 = tpu.matmul %330, %335, %cst_121 {dimension_numbers = #tpu.dot_dimension_numbers<[1], [0], [0], [1], [0, 0, 1, 1], [], []>} : vector<16x32xf32>, vector<32x128xf32>, vector<16x128xf32> -> vector<16x128xf32>
      %c0_122 = arith.constant 0 : index
      %c0_123 = arith.constant 0 : index
      %337 = vector.load %arg8[%c0_122, %c0_123] : memref<1x128xf32, #tpu.memory_space<vmem>>, vector<1x128xf32>
      %338 = vector.broadcast %337 : vector<1x128xf32> to vector<16x128xf32>
      %339 = arith.addf %336, %338 : vector<16x128xf32>
      %c0_124 = arith.constant 0 : index
      %c0_125 = arith.constant 0 : index
      %340 = vector.load %arg9[%c0_124, %c0_125] : memref<16x128xf32, #tpu.memory_space<vmem>>, vector<16x128xf32>
      tpu.vector_store %arg9[%c0_124, %c0_125], %339 {strides = array<i32>} : memref<16x128xf32, #tpu.memory_space<vmem>>, vector<16x128xf32>,
    } else {
    }
    return
  }
  func.func @transform_0(%arg0: i32) -> (i32, i32) {
    %c0_i32 = arith.constant 0 : i32
    %c0_i32_0 = arith.constant 0 : i32
    %c0_i32_1 = arith.constant 0 : i32
    return %c0_i32, %c0_i32_0 : i32, i32
  }
  func.func @transform_1(%arg0: i32) -> (i32, i32) {
    %c0_i32 = arith.constant 0 : i32
    %c0_i32_0 = arith.constant 0 : i32
    %c0_i32_1 = arith.constant 0 : i32
    return %c0_i32, %c0_i32_0 : i32, i32
  }
  func.func @transform_2(%arg0: i32) -> (i32, i32, i32) {
    %c0_i32 = arith.constant 0 : i32
    %c0_i32_0 = arith.constant 0 : i32
    %c0_i32_1 = arith.constant 0 : i32
    %c0_i32_2 = arith.constant 0 : i32
    return %c0_i32, %c0_i32_0, %c0_i32_1 : i32, i32, i32
  }
  func.func @transform_3(%arg0: i32) -> (i32, i32, i32) {
    %c0_i32 = arith.constant 0 : i32
    %c0_i32_0 = arith.constant 0 : i32
    %c0_i32_1 = arith.constant 0 : i32
    return %arg0, %c0_i32, %c0_i32_0 : i32, i32, i32
  }
  func.func @transform_4(%arg0: i32) -> (i32, i32, i32) {
    %c0_i32 = arith.constant 0 : i32
    %c0_i32_0 = arith.constant 0 : i32
    %c0_i32_1 = arith.constant 0 : i32
    return %arg0, %c0_i32, %c0_i32_0 : i32, i32, i32
  }
  func.func @transform_5(%arg0: i32) -> (i32, i32, i32) {
    %c0_i32 = arith.constant 0 : i32
    %c0_i32_0 = arith.constant 0 : i32
    %c0_i32_1 = arith.constant 0 : i32
    return %arg0, %c0_i32, %c0_i32_0 : i32, i32, i32
  }
  func.func @transform_6(%arg0: i32) -> (i32, i32) {
    %c0_i32 = arith.constant 0 : i32
    %c0_i32_0 = arith.constant 0 : i32
    %c0_i32_1 = arith.constant 0 : i32
    return %c0_i32, %c0_i32_0 : i32, i32
  }
  func.func @transform_7(%arg0: i32) -> (i32, i32) {
    %c0_i32 = arith.constant 0 : i32
    %c0_i32_0 = arith.constant 0 : i32
    %c0_i32_1 = arith.constant 0 : i32
    return %c0_i32, %c0_i32_0 : i32, i32
  }
  func.func @transform_8(%arg0: i32) -> (i32, i32) {
    %c0_i32 = arith.constant 0 : i32
    %c0_i32_0 = arith.constant 0 : i32
    %c0_i32_1 = arith.constant 0 : i32
    return %c0_i32, %c0_i32_0 : i32, i32
  }
  func.func @transform_9(%arg0: i32) -> (i32, i32, i32) {
    %c0_i32 = arith.constant 0 : i32
    %c0_i32_0 = arith.constant 0 : i32
    %c0_i32_1 = arith.constant 0 : i32
    return %arg0, %c0_i32, %c0_i32_0 : i32, i32, i32
  }
  func.func @transform_10(%arg0: i32) -> (i32, i32, i32) {
    %c0_i32 = arith.constant 0 : i32
    %c0_i32_0 = arith.constant 0 : i32
    %c0_i32_1 = arith.constant 0 : i32
    return %arg0, %c0_i32, %c0_i32_0 : i32, i32, i32
  }
}

</mosaic_0001>

<bundles_post_ra>
// kernel: decoder_with_lm_head_initial.1
= control target key start
LH: loop header
LB: loop body
LE: loop exit
PB: predicated region body
PF: predicated region fallthrough
CT: control target
= control target key end

     0   :  { %16 = vsyncpa [#allocation4], 0  ;;  %s2746_s13 = smov 0   ;;  %s3245_s0 = inlined_call_operand.vmem [shape: f32[16,32], index: 0, kind: input, shape index: {}]   ;;  %s3246_s1 = inlined_call_operand.vmem [shape: f32[32,32], index: 1, kind: input, shape index: {}]   ;;  %s3247_s2 = inlined_call_operand.vmem [shape: f32[2,1,16], index: 2, kind: input, shape index: {}]   ;;  %s3248_s3 = inlined_call_operand.vmem [shape: f32[2,32,320], index: 3, kind: input, shape index: {}]   ;;  %s3249_s4 = inlined_call_operand.vmem [shape: f32[2,64,32], index: 4, kind: input, shape index: {}]   ;;  %s3250_s5 = inlined_call_operand.vmem [shape: f32[2,1,544], index: 5, kind: input, shape index: {}]   ;;  %s3251_s6 = inlined_call_operand.vmem [shape: f32[32,128], index: 6, kind: input, shape index: {}]   ;;  %s3252_s7 = inlined_call_operand.vmem [shape: f32[1,128], index: 7, kind: input, shape index: {}]   ;;  %s3253_s8 = inlined_call_operand.hbm [shape: f32[16,128], index: 8, kind: output, shape index: {0}]   ;;  %s3254_s9 = inlined_call_operand.vmem [shape: f32[2,16,64], index: 9, kind: output, shape index: {1}]   ;;  %s3255_s10 = inlined_call_operand.vmem [shape: f32[2,32,64], index: 10, kind: output, shape index: {2}]  }
   0x1 LB: > { %s2752_s14 = sadd.s32 4294967295, %s2670_s13   ;;  %p2334_p0 = scmp.ge.s32.totalorder %s2670_s13, 1  ;;  %s2670_s13 = sphi %s2746_s13, %s22_s13  }
   0x2   : > { %p332_p1 = scmp.lt.s32.totalorder %s2670_s13, 3 }
   0x4   : > { %p333_p2 = pnand %p2334_p0, %p332_p1 }
   0x5   : > { %p384_p3 = scmp.lt.s32.totalorder (!%p333_p2), %s2752_s14, 1  ;;  %p2342_p4 = scmp.ne.s32.totalorder (!%p333_p2), %s2752_s14, 0 }
   0x6   : > { %336 = sbr.rel (%p333_p2) target bundleno = 4275 (0x10b3), region = 52 }
   0xb   : > { %s385_s15 = scalar_select %p384_p3, %s2752_s14, 1 }
   0xd   : > { %s2431_s16 = smul.u32 96, %s385_s15  ;;  %s2424_s17 = sshll.u32 %s385_s15, 6 }
   0xe   : > { %s2761_s20 = scalar_lea.vmem %s3249_s4, %s2424_s17  ;;  %s2432_s21 = smul.u32 5, %s385_s15 }
   0xf   : > { %s2766_s24 = scalar_lea.vmem %s3248_s3, %s2431_s16  ;;  %s2425_s25 = sshll.u32 %s385_s15, 4 }
  0x10   : > { %s2771_s28 = scalar_lea.vmem %s3250_s5, %s2432_s21  ;;  %s2776_s11 = scalar_lea.vmem %s3254_s9, %s2425_s25 }
  0x11   : > { %s2426_s12 = sshll.u32 %s385_s15, 5  ;;  %411 = sbr.rel (%p2342_p4) target bundleno = 25 (0x19), region = 56 }
  0x12   : > { %s2781_s19 = scalar_lea.vmem %s3255_s10, %s2426_s12 }
  0x16   : > { %v412_v0 = vld [vmem:[%s3245_s0] sm:$0xff]  ;;  %vm414_vm0 = vcmask 261120   ;;  %v413_v1 = vld [vmem:[%s3245_s0 + $0x8] sm:$0xff] }
  0x17   : > { %415 = vst.msk [vmem:[#allocation2] sm:$0xff] %vm414_vm0, %v412_v0 }
  0x18   : > { %416 = vst.msk [vmem:[#allocation2 + $0x8] sm:$0xff] %vm414_vm0, %v413_v1 }
  0x19 PF: > { %v2791_v2 = vld [vmem:[%s2766_s24 + $0x48] sm:$0xff]  ;;  %v2794_v3 = vld [vmem:[%s2766_s24 + $0x30] sm:$0xff]  ;;  %v2798_v4 = vld [vmem:[%s2766_s24 + $0x18] sm:$0xff]  ;;  %vm427_vm1 = vcmask 261120   ;;  %s2672_s15 = smov 64   ;;  %s2673_s25 = smov 96   ;;  %v468_v21 = vlaneseq }
  0x1a   : > { %446 = vmatpush.msra.mxu0 %v2791_v2  ;;  %v2801_v5 = vld [vmem:[%s2766_s24] sm:$0xff]  ;;  %s2674_s26 = smov 88   ;;  %s2675_s27 = smov 120   ;;  %vm465_vm2 = vcmask 523264   ;;  %vm479_vm3 = vcmask 64512   ;;  %vm1018_vm5 = vcmask 130048  }
  0x1b   : > { %v2536_v8 = vld [vmem:[%s2771_s28] ss:$0 sm:$0xff]  ;;  %s2676_s29 = smov 80   ;;  %s2677_s30 = smov 112   ;;  %v469_v22 = vshrl.u32 %v468_v21, 7  ;;  %v471_v23 = vand.u32 127, %v468_v21 }
  0x1c   : > { %447 = vmatpush.msra.mxu0 %v2794_v3  ;;  %s2678_s12 = smov 104   ;;  %s3262_s17 = smov 72   ;;  %v2680_v24 = vmov -3.4028235e+38   ;;  %vm1021_vm6 = vcmask 195584  }
  0x1d   : > { %vm472_vm4 = vcmp.le.s32.totalorder %v471_v23, %v469_v22  ;;  %s2682_s18 = smov 48   ;;  %s2683_s16 = smov 56  }
  0x1e   : > { %448 = vmatpush.msra.mxu0 %v2798_v4  ;;  %v2805_v6 = vld [vmem:[#allocation2] sm:$0xff]  ;;  %v2856_v25 = vsel %vm472_vm4, 0.0, %v2680_v24  ;;  %s2684_s22 = smov 32   ;;  %s3260_s21 = smov 8  }
  0x1f   : > { %v2810_v7 = vld [vmem:[#allocation2 + $0x8] sm:$0xff]  ;;  %s3258_s23 = smov 16   ;;  %p2417_p5 = scmp.ne.s32.totalorder %s2752_s14, 1 }
  0x20   : > { %449 = vmatpush.msra.mxu0 %v2801_v5 }
  0x21   : > { %2343 = vmatmul.msk.f32.vlgmr.msra.gmra.mxu0 %vm427_vm1, %v2805_v6 }
  0x29   : > { %2344 = vmatmul.msk.f32.gmra.mxu0 %vm427_vm1, %v2810_v7 }
  0x9e   : > { %v451_v9 = vpop.f32.mrf.mxu0 }
  0x9f   : > { %v2815_v10 = vadd.f32 %v2536_v8, %v451_v9 }
  0xa1   : > { %550 = vrot.lane.b32.xlu2 %v2815_v10, %s2672_s15  ;;  %459 = vrot.lane.b32.xlu0 %v2815_v10, %s2673_s25 }
  0xa6   : > { %v454_v11 = vpop.f32.mrf.mxu0 }
  0xa7   : > { %v2821_v12 = vadd.f32 %v2536_v8, %v454_v11 }
  0xa9   : > { %461 = vrot.lane.b32.xlu1 %v2821_v12, %s2673_s25  ;;  %632 = vrot.lane.b32.xlu2 %v2821_v12, %s2674_s26 }
  0xb1   : > { %602 = vrot.lane.b32.xlu1 %v2815_v10, %s2675_s27  ;;  %630 = vrot.lane.b32.xlu2 %v2821_v12, %s2675_s27 }
  0xb9   : > { %604 = vrot.lane.b32.xlu2 %v2815_v10, %s2674_s26 }
  0xc1   : > { %734 = vrot.lane.b32.xlu2 %v2815_v10, %s2676_s29 }
  0xc9   : > { %732 = vrot.lane.b32.xlu2 %v2815_v10, %s2677_s30 }
  0xd1   : > { %862 = vrot.lane.b32.xlu2 %v2815_v10, %s2678_s12 }
  0xd9   : > { %892 = vrot.lane.b32.xlu2 %v2821_v12, %s3262_s17 }
  0xfb   : > { %v551_v13 = vpop.permute.xlu2 %550 }
 0x103   : > { %v633_v14 = vpop.permute.xlu2 %632 }
 0x10b   : > { %v631_v15 = vpop.permute.xlu2 %630 }
 0x113   : > { %v460_v16 = vpop.permute.xlu0 %459  ;;  %v605_v17 = vpop.permute.xlu2 %604 }
 0x114   : > { %466 = vst.msk [vmem:[%s2776_s11] sm:$0xff] %vm465_vm2, %v460_v16  ;;  %2345 = vmatpush.xpose.msk.msra.mxu1 %vm479_vm3, %v460_v16 }
 0x117   : > { %2346 = vmatmul.msk.f32.vlgmr.msra.gmra.mxu1 %vm479_vm3, %v2815_v10 }
 0x118   : > { %571 = vmatpush.msrb.mxu1 %v551_v13 }
 0x11a   : > { %2351 = vmatpush.xpose.msk.msra.mxu1 %vm479_vm3, %v605_v17 }
 0x11b   : > { %v462_v18 = vpop.permute.xlu1 %461  ;;  %v735_v19 = vpop.permute.xlu2 %734 }
 0x11c   : > { %467 = vst.msk [vmem:[%s2776_s11 + $0x8] sm:$0xff] %vm465_vm2, %v462_v18  ;;  %2347 = vmatpush.xpose.msk.msra.mxu2 %vm479_vm3, %v462_v18  ;;  %s2681_s11 = smov 40  }
 0x11f   : > { %2348 = vmatmul.msk.f32.vlgmr.msra.gmra.mxu2 %vm479_vm3, %v2821_v12 }
 0x120   : > { %2353 = vmatpush.xpose.msk.msrb.mxu2 %vm479_vm3, %v633_v14 }
 0x123   : > { %v733_v20 = vpop.permute.xlu2 %732  ;;  %v603_v57 = vpop.permute.xlu1 %602 }
 0x124   : > { %2357 = vmatpush.xpose.msk.msra.mxu2 %vm479_vm3, %v735_v19 }
 0x127   : > { %2354 = vmatmul.msk.f32.vlgmr.msrb.gmra.mxu2 %vm479_vm3, %v631_v15 }
 0x12b   : > { %v863_v36 = vpop.permute.xlu2 %862 }
 0x12f   : > { %2358 = vmatmul.msk.f32.vlgmr.msra.gmra.mxu2 %vm479_vm3, %v733_v20 }
 0x133   : > { %v893_v40 = vpop.permute.xlu2 %892 }
 0x194   : > { %v501_v26 = vpop.f32.mrf.mxu1 }
 0x195   : > { %v502_v27 = vadd.f32 %v501_v26, %v2856_v25 }
 0x197   : > { %v528_v28 = vsel %vm479_vm3, %v502_v27, -inf }
 0x198   : > { %529 = vmax.xlane.f32.xlu0 %v528_v28 }
 0x1a2   : > { %v525_v29 = vpop.f32.mrf.mxu2 }
 0x1a3   : > { %v526_v30 = vadd.f32 %v525_v29, %v2856_v25 }
 0x1a5   : > { %v531_v31 = vsel %vm479_vm3, %v526_v30, -inf }
 0x1a6   : > { %532 = vmax.xlane.f32.xlu2 %v531_v31 }
 0x1aa   : > { %v655_v32 = vpop.f32.mrf.mxu2 }
 0x1ab   : > { %v656_v52 = vadd.f32 %v655_v32, %v2856_v25 }
 0x1ac   : > { %760 = vrot.lane.b32.xlu0 %v2821_v12, %s2677_s30 }
 0x1ad   : > { %v661_v54 = vsel %vm479_vm3, %v656_v52, -inf }
 0x1b2   : > { %v757_v33 = vpop.f32.mrf.mxu2 }
 0x1b3   : > { %v758_v34 = vadd.f32 %v757_v33, %v2856_v25 }
 0x1b5   : > { %v788_v35 = vsel %vm479_vm3, %v758_v34, -inf }
 0x1d6   : > { %789 = vmax.xlane.f32.xlu0 %v788_v35 }
 0x1ea   : > { %576 = vrot.lane.b32.xlu0 %v2821_v12, %s2672_s15 }
 0x20b   : > { %v530_v37 = vpop.xlane.xlu0 %529 }
 0x20c   : > { %v534_v38 = vsub.f32 %v502_v27, %v530_v37 }
 0x20e   : > { %v536_v39 = vmul.f32 1.442695, %v534_v38 }
 0x210   : > { %2545 = vpow2.f32 %v536_v39 }
 0x216   : > { %v2546_v41 = vpop.eup %2545 }
 0x217   : > { %v540_v42 = vsel %vm479_vm3, %v2546_v41, 0.0 }
 0x218   : > { %541 = vadd.xlane.f32.xlu1 %v540_v42 }
 0x219   : > { %v533_v43 = vpop.xlane.xlu2 %532 }
 0x21a   : > { %v535_v44 = vsub.f32 %v526_v30, %v533_v43 }
 0x21c   : > { %v538_v45 = vmul.f32 1.442695, %v535_v44 }
 0x21e   : > { %2547 = vpow2.f32 %v538_v45  ;;  %v761_v48 = vpop.permute.xlu0 %760 }
 0x224   : > { %v2548_v46 = vpop.eup %2547 }
 0x225   : > { %v543_v47 = vsel %vm479_vm3, %v2548_v46, 0.0 }
 0x226   : > { %544 = vadd.xlane.f32.xlu0 %v543_v47 }
 0x231   : > { %864 = vrot.lane.b32.xlu1 %v2815_v10, %s3262_s17 }
 0x239   : > { %762 = vrot.lane.b32.xlu1 %v2821_v12, %s2676_s29 }
 0x23a   : > { %940 = vrot.lane.b32.xlu0 %v2815_v10, %s2681_s11 }
 0x241   : > { %890 = vrot.lane.b32.xlu1 %v2821_v12, %s2678_s12 }
 0x249   : > { %v790_v49 = vpop.xlane.xlu0 %789 }
 0x24a   : > { %v794_v51 = vsub.f32 %v758_v34, %v790_v49 }
 0x24c   : > { %v796_v53 = vmul.f32 1.442695, %v794_v51 }
 0x24e   : > { %2549 = vpow2.f32 %v796_v53 }
 0x254   : > { %v2880_v55 = vpop.eup %2549 }
 0x255   : > { %v800_v56 = vsel %vm479_vm3, %v2880_v55, 0.0 }
 0x25c   : > { %v577_v50 = vpop.permute.xlu0 %576 }
 0x25d   : > { %597 = vmatpush.msra.mxu3 %v577_v50 }
 0x26b   : > { %662 = vmax.xlane.f32.xlu1 %v661_v54 }
 0x273   : > { %801 = vadd.xlane.f32.xlu1 %v800_v56 }
 0x28b   : > { %v542_v58 = vpop.xlane.xlu1 %541 }
 0x28c   : > { %2551 = vrcp.f32 %v542_v58 }
 0x292   : > { %v2552_v59 = vpop.eup %2551 }
 0x293   : > { %v548_v60 = vmul.f32 %v2552_v59, %v2546_v41 }
 0x295   : > { %2349 = vmatmul.msk.f32.vlgmr.msrb.gmra.mxu1 %vm479_vm3, %v548_v60 }
 0x299   : > { %v545_v61 = vpop.xlane.xlu0 %544 }
 0x29a   : > { %2553 = vrcp.f32 %v545_v61 }
 0x29d   : > { %2352 = vmatmul.msk.f32.vlgmr.msra.gmra.mxu1 %vm479_vm3, %v603_v57 }
 0x2a0   : > { %v2554_v62 = vpop.eup %2553 }
 0x2a1   : > { %v549_v63 = vmul.f32 %v2554_v62, %v2548_v46 }
 0x2a3   : > { %v865_v0 = vpop.permute.xlu1 %864  ;;  %2350 = vmatmul.msk.f32.vlgmr.msra.gmra.mxu3 %vm479_vm3, %v549_v63 }
 0x2a4   : > { %2363 = vmatpush.xpose.msk.msrb.mxu2 %vm479_vm3, %v865_v0 }
 0x2a7   : > { %2364 = vmatmul.msk.f32.vlgmr.msrb.gmra.mxu2 %vm479_vm3, %v863_v36 }
 0x2ab   : > { %v763_v1 = vpop.permute.xlu1 %762 }
 0x2ac   : > { %2359 = vmatpush.xpose.msk.msrb.mxu0 %vm479_vm3, %v763_v1  ;;  %v941_v53 = vpop.permute.xlu0 %940 }
 0x2af   : > { %2360 = vmatmul.msk.f32.vlgmr.msrb.gmra.mxu0 %vm479_vm3, %v761_v48 }
 0x2b0   : > { %2365 = vmatpush.xpose.msk.msra.mxu0 %vm479_vm3, %v893_v40 }
 0x2b3   : > { %v891_v8 = vpop.permute.xlu1 %890 }
 0x2b7   : > { %2366 = vmatmul.msk.f32.vlgmr.msra.gmra.mxu0 %vm479_vm3, %v891_v8 }
 0x2de   : > { %v663_v9 = vpop.xlane.xlu1 %662 }
 0x2df   : > { %v665_v11 = vsub.f32 %v656_v52, %v663_v9 }
 0x2e1   : > { %v668_v13 = vmul.f32 1.442695, %v665_v11  ;;  %v2466_v11 = vpack.i.bf16 %v2794_v3, %v2791_v2 }
 0x2e3   : > { %2555 = vpow2.f32 %v668_v13 }
 0x2e6   : > { %v802_v42 = vpop.xlane.xlu1 %801 }
 0x2e9   : > { %v2893_v14 = vpop.eup %2555 }
 0x2ea   : > { %v673_v15 = vsel %vm479_vm3, %v2893_v14, 0.0 }
 0x2eb   : > { %674 = vadd.xlane.f32.xlu0 %v673_v15 }
 0x2ff   : > { %836 = vrot.lane.b32.xlu0 %v2821_v12, %s2682_s18 }
 0x307   : > { %2467 = vrot.lane.b32.xlu0 %v2466_v11, %s2684_s22 }
 0x312   : > { %v2907_v28 = vpop.f32.mrf.mxu1 }
 0x31a   : > { %v627_v35 = vpop.f32.mrf.mxu1 }
 0x31b   : > { %v628_v36 = vadd.f32 %v627_v35, %v2856_v25 }
 0x31d   : > { %v658_v40 = vsel %vm479_vm3, %v628_v36, -inf }
 0x32a   : > { %v887_v16 = vpop.f32.mrf.mxu2 }
 0x32b   : > { %v888_v17 = vadd.f32 %v887_v16, %v2856_v25  ;;  %v2471_v16 = vpack.i.bf16 %v2801_v5, %v2798_v4 }
 0x32c   : > { %v785_v18 = vpop.f32.mrf.mxu0 }
 0x32d   : > { %v918_v19 = vsel %vm479_vm3, %v888_v17, -inf  ;;  %v786_v20 = vadd.f32 %v785_v18, %v2856_v25  ;;  %2472 = vrot.lane.b32.xlu0 %v2471_v16, %s2684_s22 }
 0x32e   : > { %919 = vmax.xlane.f32.xlu2 %v918_v19 }
 0x32f   : > { %v791_v21 = vsel %vm479_vm3, %v786_v20, -inf }
 0x334   : > { %v915_v22 = vpop.f32.mrf.mxu0 }
 0x335   : > { %v916_v23 = vadd.f32 %v915_v22, %v2856_v25 }
 0x336   : > { %792 = vmax.xlane.f32.xlu2 %v791_v21 }
 0x337   : > { %v921_v24 = vsel %vm479_vm3, %v916_v23, -inf }
 0x33e   : > { %922 = vmax.xlane.f32.xlu2 %v921_v24 }
 0x356   : > { %680 = vrot.lane.b32.xlu2 %v2815_v10, %s2683_s16 }
 0x35e   : > { %v675_v57 = vpop.xlane.xlu0 %674 }
 0x371   : > { %v837_v1 = vpop.permute.xlu0 %836 }
 0x3a1   : > { %v920_v26 = vpop.xlane.xlu2 %919 }
 0x3a2   : > { %v924_v27 = vsub.f32 %v888_v17, %v920_v26  ;;  %v599_v17 = vpop.f32.mrf.mxu3 }
 0x3a4   : > { %v926_v29 = vmul.f32 1.442695, %v924_v27  ;;  %v2537_v27 = vld [vmem:[%s2771_s28] ss:$0 sm:$0xff] }
 0x3a6   : > { %2557 = vpow2.f32 %v926_v29 }
 0x3a9   : > { %v793_v30 = vpop.xlane.xlu2 %792 }
 0x3aa   : > { %v795_v31 = vsub.f32 %v786_v20, %v793_v30  ;;  %v2468_v20 = vpop.permute.xlu0 %2467 }
 0x3ab   : > { %v2470_v21 = vunpack.i.h.bf16 %v2468_v20  ;;  %v2469_v22 = vunpack.i.l.bf16 %v2468_v20 }
 0x3ac   : > { %v2558_v32 = vpop.eup %2557  ;;  %v798_v33 = vmul.f32 1.442695, %v795_v31 }
 0x3ad   : > { %v930_v34 = vsel %vm479_vm3, %v2558_v32, 0.0  ;;  %1063 = vmatpush.msra.mxu2 %v2469_v22 }
 0x3ae   : > { %2559 = vpow2.f32 %v798_v33  ;;  %931 = vadd.xlane.f32.xlu1 %v930_v34 }
 0x3af   : > { %1064 = vmatpush.msra.mxu2 %v2470_v21 }
 0x3b1   : > { %v923_v37 = vpop.xlane.xlu2 %922 }
 0x3b2   : > { %v925_v49 = vsub.f32 %v916_v23, %v923_v37  ;;  %v2473_v23 = vpop.permute.xlu0 %2472 }
 0x3b3   : > { %v2475_v24 = vunpack.i.h.bf16 %v2473_v23  ;;  %v2474_v26 = vunpack.i.l.bf16 %v2473_v23 }
 0x3b4   : > { %v2560_v38 = vpop.eup %2559  ;;  %v928_v50 = vmul.f32 1.442695, %v925_v49 }
 0x3b5   : > { %v803_v39 = vsel %vm479_vm3, %v2560_v38, 0.0  ;;  %1065 = vmatpush.msra.mxu2 %v2474_v26 }
 0x3b6   : > { %804 = vadd.xlane.f32.xlu2 %v803_v39  ;;  %659 = vmax.xlane.f32.xlu1 %v658_v40  ;;  %v1145_v40 = vld [vmem:[%s2766_s24 + $0x50] sm:$0xff] }
 0x3b7   : > { %1066 = vmatpush.msra.mxu2 %v2475_v24  ;;  %1167 = vmatpush.msrb.mxu0 %v1145_v40 }
 0x3b9   : > { %v681_v41 = vpop.permute.xlu2 %680 }
 0x3ba   : > { %701 = vmatpush.msrb.mxu3 %v681_v41 }
 0x3ce   : > { %966 = vrot.lane.b32.xlu2 %v2821_v12, %s2681_s11  ;;  %s3256_s11 = smov 24  }
 0x3cf   : > { %810 = vrot.lane.b32.xlu1 %v2815_v10, %s2682_s18 }
 0x421   : > { %v932_v43 = vpop.xlane.xlu1 %931 }
 0x429   : > { %v660_v44 = vpop.xlane.xlu1 %659  ;;  %v805_v59 = vpop.xlane.xlu2 %804 }
 0x42a   : > { %v664_v25 = vsub.f32 %v628_v36, %v660_v44  ;;  %v1143_v44 = vld [vmem:[%s2766_s24 + $0x20] sm:$0xff] }
 0x42c   : > { %v666_v45 = vmul.f32 1.442695, %v664_v25 }
 0x42e   : > { %2561 = vpow2.f32 %v666_v45  ;;  %v1142_v45 = vld [vmem:[%s2766_s24 + $0x8] sm:$0xff] }
 0x42f   : > { %2563 = vpow2.f32 %v928_v50  ;;  %v2958_v50 = vpack.i.bf16 %v1142_v45, %v1143_v44 }
 0x431   : > { %v967_v8 = vpop.permute.xlu2 %966 }
 0x434   : > { %v2562_v46 = vpop.eup %2561 }
 0x435   : > { %v670_v47 = vsel %vm479_vm3, %v2562_v46, 0.0  ;;  %v2564_v51 = vpop.eup %2563 }
 0x436   : > { %671 = vadd.xlane.f32.xlu1 %v670_v47  ;;  %v933_v10 = vsel %vm479_vm3, %v2564_v51, 0.0 }
 0x441   : > { %v811_v48 = vpop.permute.xlu1 %810 }
 0x442   : > { %831 = vmatpush.msra.mxu3 %v811_v48 }
 0x44f   : > { %706 = vrot.lane.b32.xlu1 %v2821_v12, %s2683_s16 }
 0x479   : > { %934 = vadd.xlane.f32.xlu1 %v933_v10 }
 0x4a9   : > { %v672_v52 = vpop.xlane.xlu1 %671 }
 0x4aa   : > { %2565 = vrcp.f32 %v672_v52 }
 0x4ab   : > { %2567 = vrcp.f32 %v802_v42  ;;  %v1144_v42 = vld [vmem:[%s2766_s24 + $0x38] sm:$0xff] }
 0x4ac   : > { %2569 = vrcp.f32 %v675_v57  ;;  %1168 = vmatpush.msrb.mxu0 %v1144_v42  ;;  %v2964_v52 = vpack.i.bf16 %v1144_v42, %v1145_v40 }
 0x4ad   : > { %2571 = vrcp.f32 %v932_v43 }
 0x4ae   : > { %2573 = vrcp.f32 %v805_v59  ;;  %1169 = vmatpush.msrb.mxu0 %v1143_v44 }
 0x4b0   : > { %v2566_v54 = vpop.eup %2565  ;;  %1170 = vmatpush.msrb.mxu0 %v1142_v45 }
 0x4b1   : > { %v678_v56 = vmul.f32 %v2566_v54, %v2562_v46  ;;  %v2568_v58 = vpop.eup %2567 }
 0x4b2   : > { %v808_v12 = vmul.f32 %v2568_v58, %v2880_v55  ;;  %v2570_v60 = vpop.eup %2569 }
 0x4b3   : > { %2355 = vmatmul.msk.f32.vlgmr.msrb.gmra.mxu3 %vm479_vm3, %v678_v56  ;;  %v2572_v61 = vpop.eup %2571  ;;  %v679_v62 = vmul.f32 %v2570_v60, %v2893_v14 }
 0x4b4   : > { %961 = vmatpush.msrb.mxu3 %v941_v53  ;;  %v938_v63 = vmul.f32 %v2572_v61, %v2558_v32  ;;  %v2574_v55 = vpop.eup %2573 }
 0x4b5   : > { %v809_v9 = vmul.f32 %v2574_v55, %v2560_v38 }
 0x4bb   : > { %2361 = vmatmul.msk.f32.vlgmr.msra.gmra.mxu3 %vm479_vm3, %v808_v12 }
 0x4c1   : > { %v707_v0 = vpop.permute.xlu1 %706 }
 0x4c2   : > { %727 = vmatpush.msrb.mxu1 %v707_v0 }
 0x4c3   : > { %2356 = vmatmul.msk.f32.vlgmr.msrb.gmra.mxu1 %vm479_vm3, %v679_v62  ;;  %2367 = vmatmul.msk.f32.vlgmr.msrb.gmra.mxu3 %vm479_vm3, %v938_v63 }
 0x4c4   : > { %857 = vmatpush.msra.mxu1 %v837_v1 }
 0x4c6   : > { %987 = vmatpush.msrb.mxu1 %v967_v8 }
 0x4cb   : > { %2362 = vmatmul.msk.f32.vlgmr.msra.gmra.mxu1 %vm479_vm3, %v809_v9  ;;  %v2538_v9 = vld [vmem:[%s2771_s28 + $0x1] ss:$0 sm:$0xff] }
 0x4ec   : > { %v935_v13 = vpop.xlane.xlu1 %934 }
 0x4ed   : > { %2575 = vrcp.f32 %v935_v13 }
 0x4f3   : > { %v2576_v14 = vpop.eup %2575 }
 0x4f4   : > { %v939_v15 = vmul.f32 %v2576_v14, %v2564_v51 }
 0x4f6   : > { %2368 = vmatmul.msk.f32.vlgmr.msrb.gmra.mxu1 %vm479_vm3, %v939_v15 }
 0x536   : > { %v703_v18 = vpop.f32.mrf.mxu3 }
 0x537   : > { %994 = vrot.lane.b32.xlu1 %v703_v18, %s3260_s21  ;;  %v1178_v18 = vld [vmem:[%s2771_s28 + $0x1] sm:$0x3] }
 0x538   : > { %v1180_v20 = vperm.slane %v1178_v18, 0 }
 0x53e   : > { %v833_v2 = vpop.f32.mrf.mxu3 }
 0x53f   : > { %1002 = vrot.lane.b32.xlu2 %v833_v2, %s3258_s23  ;;  %1042 = vrot.lane.b32.xlu1 %v2537_v27, %s2684_s22  ;;  %v1138_v2 = vld [vmem:[%s3246_s1] sm:$0xff] }
 0x540   : > { %v729_v3 = vpop.f32.mrf.mxu1 }
 0x546   : > { %v963_v19 = vpop.f32.mrf.mxu3 }
 0x547   : > { %1010 = vrot.lane.b32.xlu0 %v963_v19, %s3256_s11  ;;  %996 = vrot.lane.b32.xlu2 %v729_v3, %s3260_s21  ;;  %v1181_v3 = vperm.slane %v1178_v18, 1  ;;  %v1139_v19 = vld [vmem:[%s3246_s1 + $0x8] sm:$0xff] }
 0x548   : > { %v859_v4 = vpop.f32.mrf.mxu1 }
 0x54f   : > { %1004 = vrot.lane.b32.xlu0 %v859_v4, %s3258_s23  ;;  %v1140_v4 = vld [vmem:[%s3246_s1 + $0x10] sm:$0xff] }
 0x573   : > { %v989_v5 = vpop.f32.mrf.mxu1 }
 0x574   : > { %1012 = vrot.lane.b32.xlu2 %v989_v5, %s3256_s11  ;;  %v1141_v5 = vld [vmem:[%s3246_s1 + $0x18] sm:$0xff] }
 0x599   : > { %v1003_v31 = vpop.permute.xlu2 %1002 }
 0x5a1   : > { %v997_v35 = vpop.permute.xlu2 %996 }
 0x5a2   : > { %v1017_v37 = vsel %vm479_vm3, %v599_v17, %v997_v35 }
 0x5a9   : > { %v995_v29 = vpop.permute.xlu1 %994 }
 0x5aa   : > { %v1016_v30 = vsel %vm479_vm3, %v2907_v28, %v995_v29 }
 0x5ab   : > { %v1019_v32 = vsel %vm1018_vm5, %v1016_v30, %v1003_v31 }
 0x5b1   : > { %v1043_v41 = vpop.permute.xlu1 %1042 }
 0x5b9   : > { %v1011_v33 = vpop.permute.xlu0 %1010 }
 0x5ba   : > { %v1022_v34 = vsel %vm1021_vm6, %v1019_v32, %v1011_v33 }
 0x5bb   : > { %2369 = vmatmul.msk.f32.vlgmr.msra.gmra.mxu2 %vm427_vm1, %v1022_v34 }
 0x5c1   : > { %v1005_v36 = vpop.permute.xlu0 %1004 }
 0x5c2   : > { %v1020_v38 = vsel %vm1018_vm5, %v1017_v37, %v1005_v36 }
 0x5ce   : > { %v1013_v28 = vpop.permute.xlu2 %1012 }
 0x5cf   : > { %v1023_v39 = vsel %vm1021_vm6, %v1020_v38, %v1013_v28 }
 0x5d0   : > { %2370 = vmatmul.msk.f32.gmra.mxu2 %vm427_vm1, %v1023_v39 }
 0x63e   : > { %v1068_v43 = vpop.f32.mrf.mxu2 }
 0x63f   : > { %v1069_v25 = vadd.f32 %v1068_v43, %v1043_v41 }
 0x641   : > { %v1074_v46 = vadd.f32 %v1069_v25, %v2805_v6  ;;  %v2688_v6 = vmov 32.0  }
 0x642   : > { %2577 = vrcp.f32 %v2688_v6 }
 0x643   : > { %v1077_v47 = vsel %vm427_vm1, %v1074_v46, 0.0 }
 0x644   : > { %1078 = vadd.xlane.f32.xlu0 %v1077_v47 }
 0x648   : > { %v2578_v53 = vpop.eup %2577 }
 0x649   : > { %v1084_v54 = vmul.f32 32.0, %v2578_v53  ;;  %vm1088_vm7 = vweird.f32 %v2578_v53 }
 0x64b   : > { %v1085_v56 = vsub.f32 1.0, %v1084_v54 }
 0x64d   : > { %v1086_v57 = vmul.f32 %v2578_v53, %v1085_v56 }
 0x64f   : > { %v1087_v58 = vadd.f32 %v2578_v53, %v1086_v57 }
 0x653   : > { %v1071_v48 = vpop.f32.mrf.mxu2 }
 0x654   : > { %v1072_v49 = vadd.f32 %v1071_v48, %v1043_v41 }
 0x656   : > { %v1075_v51 = vadd.f32 %v1072_v49, %v2810_v7  ;;  %v2968_v7 = vsel %vm1088_vm7, %v2578_v53, %v1087_v58 }
 0x658   : > { %v1080_v10 = vsel %vm427_vm1, %v1075_v51, 0.0  ;;  %2482 = vrot.lane.b32.xlu0 %v2958_v50, %s2673_s25 }
 0x659   : > { %1081 = vadd.xlane.f32.xlu2 %v1080_v10 }
 0x671   : > { %2477 = vrot.lane.b32.xlu2 %v2964_v52, %s2673_s25 }
 0x679   : > { %1198 = vrot.lane.b32.xlu2 %v1180_v20, %s2684_s22 }
 0x681   : > { %1146 = vrot.lane.b32.xlu2 %v2538_v9, %s2672_s15 }
 0x6b7   : > { %v1079_v12 = vpop.xlane.xlu0 %1078 }
 0x6b8   : > { %v1090_v59 = vmul.f32 %v2968_v7, %v1079_v12 }
 0x6ba   : > { %v1092_v60 = vsub.f32 %v1074_v46, %v1090_v59 }
 0x6bc   : > { %v1094_v61 = vmul.f32 %v1092_v60, %v1092_v60 }
 0x6be   : > { %v1096_v62 = vsel %vm427_vm1, %v1094_v61, 0.0 }
 0x6bf   : > { %1097 = vadd.xlane.f32.xlu1 %v1096_v62 }
 0x6ca   : > { %v2483_v13 = vpop.permute.xlu0 %2482 }
 0x6cb   : > { %v2484_v16 = vunpack.i.l.bf16 %v2483_v13  ;;  %v2485_v17 = vunpack.i.h.bf16 %v2483_v13 }
 0x6cc   : > { %v1082_v63 = vpop.xlane.xlu2 %1081 }
 0x6cd   : > { %v1091_v0 = vmul.f32 %v2968_v7, %v1082_v63 }
 0x6cf   : > { %v2973_v1 = vsub.f32 %v1075_v51, %v1091_v0 }
 0x6d1   : > { %v1095_v8 = vmul.f32 %v2973_v1, %v2973_v1 }
 0x6d3   : > { %v1099_v55 = vsel %vm427_vm1, %v1095_v8, 0.0 }
 0x6d4   : > { %1100 = vadd.xlane.f32.xlu0 %v1099_v55  ;;  %v2478_v11 = vpop.permute.xlu2 %2477 }
 0x6d5   : > { %v2480_v14 = vunpack.i.h.bf16 %v2478_v11  ;;  %v2479_v15 = vunpack.i.l.bf16 %v2478_v11 }
 0x6d7   : > { %1228 = vmatpush.msra.mxu3 %v2479_v15 }
 0x6d8   : > { %1133 = vrot.lane.b32.xlu1 %v2538_v9, %s2673_s25 }
 0x6d9   : > { %1229 = vmatpush.msra.mxu3 %v2480_v14 }
 0x6db   : > { %1230 = vmatpush.msra.mxu3 %v2484_v16  ;;  %v3051_v16 = vld [vmem:[%s3247_s2] ss:$0 sm:$0xff] }
 0x6dc   : > { %v1199_v10 = vpop.permute.xlu2 %1198 }
 0x6dd   : > { %1231 = vmatpush.msra.mxu3 %v2485_v17 }
 0x6de   : > { %2373 = vmatmul.msk.f32.vlgmr.msra.gmra.mxu3 %vm427_vm1, %v1138_v2 }
 0x6e0   : > { %1200 = vrot.lane.b32.xlu1 %v1181_v3, %s2684_s22  ;;  %v3059_v3 = vld [vmem:[%s3247_s2 + $0x1] ss:$0 sm:$0xff] }
 0x6e6   : > { %2374 = vmatmul.msk.f32.gmra.mxu3 %vm427_vm1, %v1139_v19 }
 0x6ee   : > { %2375 = vmatmul.msk.f32.gmra.mxu3 %vm427_vm1, %v1140_v4 }
 0x6f6   : > { %2376 = vmatmul.msk.f32.gmra.mxu3 %vm427_vm1, %v1141_v5 }
 0x732   : > { %v1098_v21 = vpop.xlane.xlu1 %1097 }
 0x733   : > { %v1102_v22 = vmul.f32 %v1098_v21, %v2968_v7 }
 0x735   : > { %v1104_v23 = vadd.f32 1e-05, %v1102_v22 }
 0x737   : > { %2579 = vrsqrt.f32 %v1104_v23  ;;  %vm1112_vm9 = vweird.f32 %v1104_v23 }
 0x73d   : > { %v2580_v24 = vpop.eup %2579 }
 0x73e   : > { %v1107_v26 = vmul.f32 %v2580_v24, %v1104_v23  ;;  %vm1113_vm8 = vweird.f32 %v2580_v24 }
 0x73f   : > { %vm1114_vm10 = vmor %vm1112_vm9, %vm1113_vm8 }
 0x740   : > { %v1108_v27 = vmul.f32 %v2580_v24, %v1107_v26 }
 0x742   : > { %v1109_v29 = vmul.f32 0.5, %v1108_v27 }
 0x744   : > { %v1110_v30 = vsub.f32 1.5, %v1109_v29 }
 0x746   : > { %v1111_v31 = vmul.f32 %v2580_v24, %v1110_v30 }
 0x747   : > { %v1101_v32 = vpop.xlane.xlu0 %1100 }
 0x748   : > { %v1103_v33 = vmul.f32 %v1101_v32, %v2968_v7  ;;  %v1115_v34 = vsel %vm1114_vm10, %v2580_v24, %v1111_v31 }
 0x749   : > { %v1126_v35 = vmul.f32 %v1115_v34, %v1092_v60  ;;  %v1147_v60 = vpop.permute.xlu2 %1146 }
 0x74a   : > { %v1105_v36 = vadd.f32 1e-05, %v1103_v33  ;;  %v1134_v37 = vpop.permute.xlu1 %1133 }
 0x74b   : > { %v1131_v38 = vmul.f32 %v2538_v9, %v1126_v35 }
 0x74c   : > { %2581 = vrsqrt.f32 %v1105_v36  ;;  %vm1122_vm12 = vweird.f32 %v1105_v36 }
 0x74d   : > { %v3002_v28 = vadd.f32 %v1134_v37, %v1131_v38 }
 0x74f   : > { %2371 = vmatmul.msk.f32.vlgmr.msrb.gmra.mxu0 %vm427_vm1, %v3002_v28 }
 0x752   : > { %v2582_v39 = vpop.eup %2581  ;;  %v1201_v49 = vpop.permute.xlu1 %1200 }
 0x753   : > { %v1117_v40 = vmul.f32 %v2582_v39, %v1105_v36  ;;  %vm1123_vm11 = vweird.f32 %v2582_v39  ;;  %v1202_v6 = vsel %vm427_vm1, %v1199_v10, %v1201_v49 }
 0x754   : > { %vm1124_vm13 = vmor %vm1122_vm12, %vm1123_vm11 }
 0x755   : > { %v1118_v41 = vmul.f32 %v2582_v39, %v1117_v40 }
 0x757   : > { %v1119_v42 = vmul.f32 0.5, %v1118_v41 }
 0x759   : > { %v1120_v43 = vsub.f32 1.5, %v1119_v42 }
 0x75b   : > { %v1121_v44 = vmul.f32 %v2582_v39, %v1120_v43 }
 0x75d   : > { %v1125_v25 = vsel %vm1124_vm13, %v2582_v39, %v1121_v44 }
 0x75e   : > { %v1127_v45 = vmul.f32 %v1125_v25, %v2973_v1 }
 0x760   : > { %v1132_v46 = vmul.f32 %v2538_v9, %v1127_v45 }
 0x761   : > { %v1233_v48 = vpop.f32.mrf.mxu3 }
 0x762   : > { %v3007_v47 = vadd.f32 %v1134_v37, %v1132_v46  ;;  %v1234_v53 = vadd.f32 %v1233_v48, %v1202_v6 }
 0x764   : > { %2372 = vmatmul.msk.f32.gmra.mxu0 %vm427_vm1, %v3007_v47  ;;  %1245 = vst.msk [vmem:[%s2781_s19] sm:$0xff] %vm465_vm2, %v1234_v53  ;;  %1402 = vrot.lane.b32.xlu2 %v1234_v53, %s2675_s27 }
 0x769   : > { %v1236_v51 = vpop.f32.mrf.mxu3 }
 0x76a   : > { %v1237_v54 = vadd.f32 %v1236_v51, %v1202_v6 }
 0x76c   : > { %1404 = vrot.lane.b32.xlu1 %v1237_v54, %s2675_s27  ;;  %v3015_v56 = vpack.i.bf16 %v1234_v53, %v1237_v54  ;;  %2377 = vmatpush.xpose.msk.msra.mxu1 %vm479_vm3, %v1237_v54  ;;  %1246 = vst.msk [vmem:[%s2781_s19 + $0x8] sm:$0xff] %vm465_vm2, %v1237_v54 }
 0x76e   : > { %2487 = vrot.lane.b32.xlu0 %v3015_v56, %s2673_s25 }
 0x770   : > { %2378 = vmatpush.xpose.msk.msra.mxu1 %vm479_vm3, %v1234_v53 }
 0x771   : > { %v1239_v57 = vpop.f32.mrf.mxu3 }
 0x772   : > { %v1240_v58 = vadd.f32 %v1239_v57, %v1202_v6 }
 0x774   : > { %1247 = vst.msk [vmem:[%s2781_s19 + $0x10] sm:$0xff] %vm465_vm2, %v1240_v58 }
 0x776   : > { %1548 = vrot.lane.b32.xlu0 %v1237_v54, %s2677_s30 }
 0x779   : > { %v1242_v12 = vpop.f32.mrf.mxu3 }
 0x77a   : > { %v3028_v59 = vadd.f32 %v1242_v12, %v1202_v6 }
 0x77c   : > { %1248 = vst.msk [vmem:[%s2781_s19 + $0x18] sm:$0xff] %vm465_vm2, %v3028_v59  ;;  %2380 = vmatpush.xpose.msk.msrb.mxu1 %vm479_vm3, %v3028_v59  ;;  %1436 = vrot.lane.b32.xlu2 %v3028_v59, %s2675_s27  ;;  %v3076_v24 = vpack.i.bf16 %v1240_v58, %v3028_v59 }
 0x77e   : > { %1546 = vrot.lane.b32.xlu0 %v1234_v53, %s2677_s30 }
 0x780   : > { %2381 = vmatpush.xpose.msk.msrb.mxu1 %vm479_vm3, %v1240_v58 }
 0x7be   : > { %v1403_v1 = vpop.permute.xlu2 %1402 }
 0x7cc   : > { %v1172_v61 = vpop.f32.mrf.mxu0 }
 0x7cd   : > { %v1173_v62 = vadd.f32 %v1172_v61, %v1147_v60 }
 0x7cf   : > { %1400 = vrot.lane.b32.xlu1 %v1173_v62, %s2675_s27  ;;  %2379 = vmatmul.msk.f32.vlgmr.msra.gmra.mxu1 %vm479_vm3, %v1173_v62 }
 0x7d6   : > { %v1437_v13 = vpop.permute.xlu2 %1436 }
 0x7d7   : > { %1434 = vrot.lane.b32.xlu1 %v1240_v58, %s2675_s27 }
 0x7de   : > { %v1405_v8 = vpop.permute.xlu1 %1404 }
 0x7df   : > { %1544 = vrot.lane.b32.xlu1 %v1173_v62, %s2677_s30  ;;  %2385 = vmatpush.xpose.msk.msra.mxu1 %vm479_vm3, %v1405_v8 }
 0x7e0   : > { %v2488_v55 = vpop.permute.xlu0 %2487 }
 0x7e1   : > { %v1175_v63 = vpop.f32.mrf.mxu0  ;;  %v2490_v9 = vunpack.i.h.bf16 %v2488_v55  ;;  %v2489_v11 = vunpack.i.l.bf16 %v2488_v55 }
 0x7e2   : > { %v1176_v0 = vadd.f32 %v1175_v63, %v1147_v60 }
 0x7e3   : > { %2386 = vmatpush.xpose.msk.msra.mxu1 %vm479_vm3, %v1403_v1  ;;  %1365 = vmatpush.msrb.mxu2 %v2489_v11 }
 0x7e4   : > { %1432 = vrot.lane.b32.xlu0 %v1176_v0, %s2675_s27  ;;  %2382 = vmatmul.msk.f32.vlgmr.msrb.gmra.mxu1 %vm479_vm3, %v1176_v0 }
 0x7e5   : > { %1366 = vmatpush.msrb.mxu2 %v2490_v9 }
 0x7e7   : > { %2388 = vmatpush.xpose.msk.msra.mxu2 %vm479_vm3, %v1437_v13 }
 0x7e8   : > { %v1549_v37 = vpop.permute.xlu0 %1548 }
 0x7f0   : > { %v1547_v38 = vpop.permute.xlu0 %1546 }
 0x841   : > { %v1401_v14 = vpop.permute.xlu1 %1400 }
 0x842   : > { %2387 = vmatmul.msk.f32.vlgmr.msra.gmra.mxu1 %vm479_vm3, %v1401_v14 }
 0x849   : > { %v1435_v15 = vpop.permute.xlu1 %1434 }
 0x84a   : > { %2389 = vmatpush.xpose.msk.msra.mxu2 %vm479_vm3, %v1435_v15 }
 0x84c   : > { %v1288_v17 = vpop.f32.mrf.mxu1 }
 0x84d   : > { %v1289_v18 = vadd.f32 %v3051_v16, %v1288_v17 }
 0x84f   : > { %v1320_v2 = vsel %vm1018_vm5, %v1289_v18, -inf }
 0x850   : > { %1321 = vmax.xlane.f32.xlu2 %v1320_v2 }
 0x851   : > { %v1545_v23 = vpop.permute.xlu1 %1544 }
 0x856   : > { %v1433_v40 = vpop.permute.xlu0 %1432 }
 0x861   : > { %v1317_v19 = vpop.f32.mrf.mxu1 }
 0x862   : > { %v1318_v4 = vadd.f32 %v3059_v3, %v1317_v19 }
 0x864   : > { %v1323_v5 = vsel %vm1018_vm5, %v1318_v4, -inf }
 0x865   : > { %1324 = vmax.xlane.f32.xlu1 %v1323_v5 }
 0x868   : > { %1580 = vrot.lane.b32.xlu2 %v3028_v59, %s2677_s30 }
 0x87e   : > { %1692 = vrot.lane.b32.xlu1 %v1237_v54, %s2678_s12 }
 0x886   : > { %1690 = vrot.lane.b32.xlu1 %v1234_v53, %s2678_s12 }
 0x88e   : > { %1688 = vrot.lane.b32.xlu1 %v1173_v62, %s2678_s12 }
 0x896   : > { %2497 = vrot.lane.b32.xlu1 %v3015_v56, %s2674_s26 }
 0x89e   : > { %1578 = vrot.lane.b32.xlu1 %v1240_v58, %s2677_s30 }
 0x8a6   : > { %1576 = vrot.lane.b32.xlu1 %v1176_v0, %s2677_s30  ;;  %s3264_s30 = smov 72  }
 0x8ae   : > { %1722 = vrot.lane.b32.xlu1 %v1240_v58, %s2678_s12 }
 0x8bf   : > { %v1429_v20 = vpop.f32.mrf.mxu1 }
 0x8c0   : > { %v1430_v21 = vadd.f32 %v3051_v16, %v1429_v20 }
 0x8c2   : > { %v1464_v22 = vsel %vm1018_vm5, %v1430_v21, -inf }
 0x8c3   : > { %1465 = vmax.xlane.f32.xlu0 %v1464_v22  ;;  %v1322_v32 = vpop.xlane.xlu2 %1321 }
 0x8c4   : > { %v1326_v33 = vsub.f32 %v1289_v18, %v1322_v32 }
 0x8c6   : > { %v1328_v34 = vmul.f32 1.442695, %v1326_v33 }
 0x8cb   : > { %v1581_v54 = vpop.permute.xlu2 %1580 }
 0x8d7   : > { %2492 = vrot.lane.b32.xlu0 %v3076_v24, %s2673_s25 }
 0x8d8   : > { %v1325_v26 = vpop.xlane.xlu1 %1324 }
 0x8d9   : > { %v1327_v27 = vsub.f32 %v1318_v4, %v1325_v26 }
 0x8db   : > { %v1330_v29 = vmul.f32 1.442695, %v1327_v27 }
 0x8dd   : > { %2583 = vpow2.f32 %v1330_v29 }
 0x8de   : > { %2585 = vpow2.f32 %v1328_v34 }
 0x8e3   : > { %v2584_v30 = vpop.eup %2583 }
 0x8e4   : > { %v1335_v31 = vsel %vm1018_vm5, %v2584_v30, 0.0  ;;  %v2586_v35 = vpop.eup %2585 }
 0x8e5   : > { %1336 = vadd.xlane.f32.xlu2 %v1335_v31  ;;  %v1332_v36 = vsel %vm1018_vm5, %v2586_v35, 0.0 }
 0x8f0   : > { %v1693_v39 = vpop.permute.xlu1 %1692 }
 0x8f8   : > { %v1691_v41 = vpop.permute.xlu1 %1690 }
 0x8fd   : > { %1720 = vrot.lane.b32.xlu2 %v1176_v0, %s2678_s12 }
 0x900   : > { %v1689_v25 = vpop.permute.xlu1 %1688 }
 0x901   : > { %1333 = vadd.xlane.f32.xlu0 %v1332_v36 }
 0x908   : > { %v2498_v49 = vpop.permute.xlu1 %2497 }
 0x909   : > { %v2499_v6 = vunpack.i.l.bf16 %v2498_v49  ;;  %v2500_v53 = vunpack.i.h.bf16 %v2498_v49 }
 0x910   : > { %v1579_v60 = vpop.permute.xlu1 %1578 }
 0x918   : > { %v1577_v8 = vpop.permute.xlu1 %1576 }
 0x920   : > { %v1723_v9 = vpop.permute.xlu1 %1722 }
 0x936   : > { %v1466_v42 = vpop.xlane.xlu0 %1465 }
 0x937   : > { %v1470_v43 = vsub.f32 %v1430_v21, %v1466_v42 }
 0x939   : > { %v1472_v44 = vmul.f32 1.442695, %v1470_v43 }
 0x93b   : > { %2587 = vpow2.f32 %v1472_v44 }
 0x941   : > { %v2588_v45 = vpop.eup %2587 }
 0x942   : > { %v1476_v46 = vsel %vm1018_vm5, %v2588_v45, 0.0 }
 0x943   : > { %1477 = vadd.xlane.f32.xlu0 %v1476_v46 }
 0x949   : > { %v2493_v48 = vpop.permute.xlu0 %2492 }
 0x94a   : > { %v2494_v51 = vunpack.i.l.bf16 %v2493_v48  ;;  %v2495_v10 = vunpack.i.h.bf16 %v2493_v48 }
 0x94c   : > { %1394 = vmatpush.msra.mxu0 %v2494_v51 }
 0x94e   : > { %1395 = vmatpush.msra.mxu0 %v2495_v10 }
 0x950   : > { %1509 = vmatpush.msrb.mxu0 %v2499_v6 }
 0x952   : > { %1510 = vmatpush.msrb.mxu0 %v2500_v53 }
 0x957   : > { %1724 = vrot.lane.b32.xlu0 %v3028_v59, %s2678_s12  ;;  %s3267_s12 = smov 24  }
 0x958   : > { %v1337_v57 = vpop.xlane.xlu2 %1336 }
 0x959   : > { %2589 = vrcp.f32 %v1337_v57 }
 0x95f   : > { %v2590_v58 = vpop.eup %2589 }
 0x960   : > { %v1341_v12 = vmul.f32 %v2590_v58, %v2584_v30  ;;  %v1721_v11 = vpop.permute.xlu2 %1720 }
 0x962   : > { %2384 = vmatmul.msk.f32.vlgmr.msra.gmra.mxu0 %vm1018_vm5, %v1341_v12 }
 0x963   : > { %2396 = vmatpush.xpose.msk.msra.mxu0 %vm479_vm3, %v1581_v54 }
 0x967   : > { %2397 = vmatpush.xpose.msk.msra.mxu0 %vm479_vm3, %v1579_v60 }
 0x974   : > { %v1334_v61 = vpop.xlane.xlu0 %1333 }
 0x975   : > { %2591 = vrcp.f32 %v1334_v61 }
 0x97b   : > { %v2592_v62 = vpop.eup %2591 }
 0x97c   : > { %v1340_v63 = vmul.f32 %v2592_v62, %v2586_v35 }
 0x97e   : > { %2383 = vmatmul.msk.f32.vlgmr.msrb.gmra.mxu2 %vm1018_vm5, %v1340_v63 }
 0x97f   : > { %2393 = vmatpush.xpose.msk.msrb.mxu2 %vm479_vm3, %v1549_v37 }
 0x983   : > { %2394 = vmatpush.xpose.msk.msrb.mxu2 %vm479_vm3, %v1547_v38 }
 0x986   : > { %2390 = vmatmul.msk.f32.vlgmr.msra.gmra.mxu2 %vm479_vm3, %v1433_v40 }
 0x987   : > { %2401 = vmatpush.xpose.msk.msra.mxu2 %vm479_vm3, %v1693_v39 }
 0x98b   : > { %2402 = vmatpush.xpose.msk.msra.mxu2 %vm479_vm3, %v1691_v41 }
 0x98e   : > { %2395 = vmatmul.msk.f32.vlgmr.msrb.gmra.mxu2 %vm479_vm3, %v1545_v23 }
 0x996   : > { %2403 = vmatmul.msk.f32.vlgmr.msra.gmra.mxu2 %vm479_vm3, %v1689_v25 }
 0x9b6   : > { %v1478_v59 = vpop.xlane.xlu0 %1477 }
 0x9b7   : > { %2593 = vrcp.f32 %v1478_v59 }
 0x9bd   : > { %v2594_v0 = vpop.eup %2593 }
 0x9be   : > { %v1484_v1 = vmul.f32 %v2594_v0, %v2588_v45 }
 0x9c0   : > { %2391 = vmatmul.msk.f32.vlgmr.msrb.gmra.mxu0 %vm1018_vm5, %v1484_v1 }
 0x9c8   : > { %2398 = vmatmul.msk.f32.vlgmr.msra.gmra.mxu0 %vm479_vm3, %v1577_v8 }
 0x9c9   : > { %v1725_v55 = vpop.permute.xlu0 %1724 }
 0x9ca   : > { %2404 = vmatpush.xpose.msk.msrb.mxu0 %vm479_vm3, %v1725_v55 }
 0x9ce   : > { %2405 = vmatpush.xpose.msk.msrb.mxu0 %vm479_vm3, %v1723_v9 }
 0x9d1   : > { %2406 = vmatmul.msk.f32.vlgmr.msrb.gmra.mxu0 %vm479_vm3, %v1721_v11 }
 0x9df   : > { %v3110_v21 = vpop.f32.mrf.mxu0 }
 0xa01   : > { %v3102_v13 = vpop.f32.mrf.mxu2 }
 0xa09   : > { %v1461_v14 = vpop.f32.mrf.mxu2 }
 0xa0a   : > { %v1462_v15 = vadd.f32 %v3059_v3, %v1461_v14 }
 0xa0c   : > { %v1467_v17 = vsel %vm1018_vm5, %v1462_v15, -inf }
 0xa0d   : > { %1468 = vmax.xlane.f32.xlu2 %v1467_v17 }
 0xa11   : > { %v1573_v18 = vpop.f32.mrf.mxu2 }
 0xa12   : > { %v1574_v2 = vadd.f32 %v3051_v16, %v1573_v18 }
 0xa14   : > { %v1608_v19 = vsel %vm1018_vm5, %v1574_v2, -inf }
 0xa15   : > { %1609 = vmax.xlane.f32.xlu1 %v1608_v19 }
 0xa19   : > { %v1717_v4 = vpop.f32.mrf.mxu2 }
 0xa1a   : > { %v1718_v5 = vadd.f32 %v3051_v16, %v1717_v4 }
 0xa1c   : > { %v1752_v20 = vsel %vm1018_vm5, %v1718_v5, -inf }
 0xa1d   : > { %1753 = vmax.xlane.f32.xlu0 %v1752_v20 }
 0xa3d   : > { %v1512_v22 = vpop.f32.mrf.mxu0 }
 0xa45   : > { %v1605_v23 = vpop.f32.mrf.mxu0 }
 0xa46   : > { %v1606_v26 = vadd.f32 %v3059_v3, %v1605_v23 }
 0xa48   : > { %v1611_v27 = vsel %vm1018_vm5, %v1606_v26, -inf }
 0xa49   : > { %1612 = vmax.xlane.f32.xlu2 %v1611_v27 }
 0xa4e   : > { %v1749_v29 = vpop.f32.mrf.mxu0 }
 0xa4f   : > { %v1750_v30 = vadd.f32 %v3059_v3, %v1749_v29 }
 0xa51   : > { %v1755_v31 = vsel %vm1018_vm5, %v1750_v30, -inf }
 0xa52   : > { %1756 = vmax.xlane.f32.xlu1 %v1755_v31 }
 0xa6b   : > { %2502 = vrot.lane.b32.xlu1 %v3015_v56, %s2676_s29 }
 0xa73   : > { %2517 = vrot.lane.b32.xlu1 %v3076_v24, %s2676_s29  ;;  %s3266_s29 = smov 16  }
 0xa7b   : > { %2522 = vrot.lane.b32.xlu1 %v3076_v24, %s3264_s30 }
 0xa80   : > { %v1469_v16 = vpop.xlane.xlu2 %1468 }
 0xa81   : > { %v1471_v32 = vsub.f32 %v1462_v15, %v1469_v16 }
 0xa83   : > { %v1474_v33 = vmul.f32 1.442695, %v1471_v32  ;;  %2527 = vrot.lane.b32.xlu1 %v2964_v52, %s2684_s22 }
 0xa85   : > { %2595 = vpow2.f32 %v1474_v33 }
 0xa88   : > { %v1610_v3 = vpop.xlane.xlu1 %1609 }
 0xa89   : > { %v1614_v34 = vsub.f32 %v1574_v2, %v1610_v3 }
 0xa8b   : > { %v2596_v35 = vpop.eup %2595  ;;  %v1616_v36 = vmul.f32 1.442695, %v1614_v34  ;;  %2532 = vrot.lane.b32.xlu1 %v2958_v50, %s2684_s22 }
 0xa8c   : > { %v1479_v37 = vsel %vm1018_vm5, %v2596_v35, 0.0 }
 0xa8d   : > { %2597 = vpow2.f32 %v1616_v36  ;;  %1480 = vadd.xlane.f32.xlu2 %v1479_v37  ;;  %v2541_v37 = vld [vmem:[%s2771_s28 + $0x2] ss:$0 sm:$0xff] }
 0xa90   : > { %v1754_v38 = vpop.xlane.xlu0 %1753 }
 0xa91   : > { %v1758_v39 = vsub.f32 %v1718_v5, %v1754_v38 }
 0xa93   : > { %v2598_v40 = vpop.eup %2597  ;;  %v1760_v41 = vmul.f32 1.442695, %v1758_v39 }
 0xa94   : > { %v1620_v42 = vsel %vm1018_vm5, %v2598_v40, 0.0 }
 0xa95   : > { %2599 = vpow2.f32 %v1760_v41  ;;  %1621 = vadd.xlane.f32.xlu0 %v1620_v42 }
 0xa9b   : > { %v3128_v52 = vpop.eup %2599 }
 0xa9c   : > { %v1764_v43 = vsel %vm1018_vm5, %v3128_v52, 0.0 }
 0xa9d   : > { %1765 = vadd.xlane.f32.xlu0 %v1764_v43 }
 0xaa5   : > { %2507 = vrot.lane.b32.xlu2 %v3076_v24, %s2674_s26  ;;  %s3265_s26 = smov 8  }
 0xabc   : > { %v1613_v50 = vpop.xlane.xlu2 %1612 }
 0xabd   : > { %v1615_v44 = vsub.f32 %v1606_v26, %v1613_v50 }
 0xabf   : > { %v1618_v25 = vmul.f32 1.442695, %v1615_v44 }
 0xac1   : > { %2601 = vpow2.f32 %v1618_v25 }
 0xac5   : > { %v1757_v45 = vpop.xlane.xlu1 %1756 }
 0xac6   : > { %v1759_v46 = vsub.f32 %v1750_v30, %v1757_v45 }
 0xac7   : > { %v2602_v48 = vpop.eup %2601 }
 0xac8   : > { %v1762_v49 = vmul.f32 1.442695, %v1759_v46  ;;  %v1623_v51 = vsel %vm1018_vm5, %v2602_v48, 0.0 }
 0xac9   : > { %1624 = vadd.xlane.f32.xlu0 %v1623_v51 }
 0xaca   : > { %2603 = vpow2.f32 %v1762_v49 }
 0xad0   : > { %v2604_v10 = vpop.eup %2603 }
 0xad1   : > { %v1767_v6 = vsel %vm1018_vm5, %v2604_v10, 0.0 }
 0xad2   : > { %1768 = vadd.xlane.f32.xlu2 %v1767_v6 }
 0xadd   : > { %v2503_v53 = vpop.permute.xlu1 %2502  ;;  %2512 = vrot.lane.b32.xlu0 %v3015_v56, %s3264_s30 }
 0xade   : > { %v2504_v24 = vunpack.i.l.bf16 %v2503_v53  ;;  %v2505_v54 = vunpack.i.h.bf16 %v2503_v53 }
 0xae0   : > { %1653 = vmatpush.msrb.mxu3 %v2504_v24 }
 0xae2   : > { %1654 = vmatpush.msrb.mxu3 %v2505_v54  ;;  %v2542_v54 = vld [vmem:[%s2771_s28 + $0x2] ss:$0 sm:$0xff] }
 0xae5   : > { %1834 = vrot.lane.b32.xlu0 %v1512_v22, %s3265_s26  ;;  %v2518_v58 = vpop.permute.xlu1 %2517 }
 0xae6   : > { %v2519_v0 = vunpack.i.l.bf16 %v2518_v58  ;;  %v2520_v8 = vunpack.i.h.bf16 %v2518_v58 }
 0xaea   : > { %1880 = vrot.lane.b32.xlu2 %v2541_v37, %s2673_s25 }
 0xaed   : > { %v2523_v1 = vpop.permute.xlu1 %2522 }
 0xaee   : > { %v2524_v55 = vunpack.i.l.bf16 %v2523_v1  ;;  %v2525_v11 = vunpack.i.h.bf16 %v2523_v1  ;;  %v1973_v1 = vld [vmem:[%s2766_s24 + $0x40] sm:$0xff] }
 0xaf5   : > { %v2528_v32 = vpop.permute.xlu1 %2527 }
 0xaf6   : > { %v2530_v33 = vunpack.i.h.bf16 %v2528_v32  ;;  %v2529_v3 = vunpack.i.l.bf16 %v2528_v32 }
 0xaf8   : > { %1901 = vmatpush.msrb.mxu2 %v2529_v3 }
 0xafa   : > { %1902 = vmatpush.msrb.mxu2 %v2530_v33 }
 0xafd   : > { %v2533_v34 = vpop.permute.xlu1 %2532 }
 0xafe   : > { %v2534_v36 = vunpack.i.l.bf16 %v2533_v34 }
 0xb00   : > { %v1481_v57 = vpop.xlane.xlu2 %1480  ;;  %1903 = vmatpush.msrb.mxu2 %v2534_v36 }
 0xb01   : > { %2605 = vrcp.f32 %v1481_v57 }
 0xb07   : > { %v2606_v61 = vpop.eup %2605 }
 0xb08   : > { %v1622_v12 = vpop.xlane.xlu0 %1621  ;;  %v2508_v60 = vpop.permute.xlu2 %2507  ;;  %v1485_v59 = vmul.f32 %v2606_v61, %v2596_v35  ;;  %v2535_v35 = vunpack.i.h.bf16 %v2533_v34 }
 0xb09   : > { %2607 = vrcp.f32 %v1622_v12  ;;  %v2509_v62 = vunpack.i.l.bf16 %v2508_v60  ;;  %v2510_v63 = vunpack.i.h.bf16 %v2508_v60 }
 0xb0a   : > { %1904 = vmatpush.msrb.mxu2 %v2535_v35 }
 0xb0b   : > { %1538 = vmatpush.msrb.mxu1 %v2509_v62 }
 0xb0d   : > { %1539 = vmatpush.msrb.mxu1 %v2510_v63 }
 0xb0e   : > { %2392 = vmatmul.msk.f32.vlgmr.msrb.gmra.mxu1 %vm1018_vm5, %v1485_v59 }
 0xb0f   : > { %v2608_v56 = vpop.eup %2607  ;;  %1682 = vmatpush.msra.mxu1 %v2519_v0  ;;  %v1974_v0 = vld [vmem:[%s2766_s24 + $0x58] sm:$0xff] }
 0xb10   : > { %v1628_v9 = vmul.f32 %v2608_v56, %v2598_v40  ;;  %v1766_v14 = vpop.xlane.xlu0 %1765  ;;  %1997 = vmatpush.msra.mxu0 %v1974_v0 }
 0xb11   : > { %1683 = vmatpush.msra.mxu1 %v2520_v8 }
 0xb12   : > { %2399 = vmatmul.msk.f32.vlgmr.msrb.gmra.mxu3 %vm1018_vm5, %v1628_v9  ;;  %1998 = vmatpush.msra.mxu0 %v1973_v1 }
 0xb13   : > { %1826 = vmatpush.msrb.mxu1 %v2524_v55  ;;  %v1972_v55 = vld [vmem:[%s2766_s24 + $0x28] sm:$0xff] }
 0xb14   : > { %1999 = vmatpush.msra.mxu0 %v1972_v55 }
 0xb15   : > { %1827 = vmatpush.msrb.mxu1 %v2525_v11  ;;  %v1971_v11 = vld [vmem:[%s2766_s24 + $0x10] sm:$0xff] }
 0xb16   : > { %2000 = vmatpush.msra.mxu0 %v1971_v11 }
 0xb3c   : > { %v1625_v15 = vpop.xlane.xlu0 %1624 }
 0xb3d   : > { %2609 = vrcp.f32 %v1625_v15 }
 0xb43   : > { %v2610_v17 = vpop.eup %2609 }
 0xb44   : > { %v1629_v18 = vmul.f32 %v2610_v17, %v2602_v48 }
 0xb45   : > { %v1769_v2 = vpop.xlane.xlu2 %1768 }
 0xb46   : > { %2611 = vrcp.f32 %v1769_v2  ;;  %2400 = vmatmul.msk.f32.vlgmr.msra.gmra.mxu1 %vm1018_vm5, %v1629_v18 }
 0xb47   : > { %2613 = vrcp.f32 %v1766_v14 }
 0xb4c   : > { %v2612_v19 = vpop.eup %2611 }
 0xb4d   : > { %v1773_v4 = vmul.f32 %v2612_v19, %v2604_v10  ;;  %v2614_v20 = vpop.eup %2613  ;;  %v3180_v19 = vld [vmem:[%s2771_s28 + $0x3] ss:$0 sm:$0xff] }
 0xb4e   : > { %v1772_v26 = vmul.f32 %v2614_v20, %v3128_v52 }
 0xb4f   : > { %v2513_v5 = vpop.permute.xlu0 %2512  ;;  %2408 = vmatmul.msk.f32.vlgmr.msrb.gmra.mxu1 %vm1018_vm5, %v1773_v4 }
 0xb50   : > { %v2514_v22 = vunpack.i.l.bf16 %v2513_v5  ;;  %v2515_v23 = vunpack.i.h.bf16 %v2513_v5 }
 0xb52   : > { %1797 = vmatpush.msra.mxu3 %v2514_v22 }
 0xb54   : > { %1798 = vmatpush.msra.mxu3 %v2515_v23 }
 0xb55   : > { %2407 = vmatmul.msk.f32.vlgmr.msra.gmra.mxu3 %vm1018_vm5, %v1772_v26 }
 0xb57   : > { %v1835_v38 = vpop.permute.xlu0 %1834 }
 0xb58   : > { %v1856_v40 = vsel %vm479_vm3, %v3102_v13, %v1835_v38  ;;  %v1881_v13 = vpop.permute.xlu2 %1880 }
 0xb8b   : > { %v1541_v29 = vpop.f32.mrf.mxu1 }
 0xb95   : > { %v1656_v27 = vpop.f32.mrf.mxu3 }
 0xb96   : > { %1842 = vrot.lane.b32.xlu0 %v1656_v27, %s3266_s29 }
 0xb9e   : > { %1836 = vrot.lane.b32.xlu0 %v1541_v29, %s3265_s26 }
 0xbc3   : > { %v1685_v30 = vpop.f32.mrf.mxu1 }
 0xbcc   : > { %v1829_v31 = vpop.f32.mrf.mxu1 }
 0xbcd   : > { %1852 = vrot.lane.b32.xlu0 %v1829_v31, %s3267_s12 }
 0xbd8   : > { %v1800_v16 = vpop.f32.mrf.mxu3 }
 0xbd9   : > { %1850 = vrot.lane.b32.xlu1 %v1800_v16, %s3267_s12 }
 0xbe1   : > { %1844 = vrot.lane.b32.xlu1 %v1685_v30, %s3266_s29 }
 0xc08   : > { %v1843_v39 = vpop.permute.xlu0 %1842 }
 0xc09   : > { %v1858_v41 = vsel %vm1018_vm5, %v1856_v40, %v1843_v39  ;;  %v2055_v40 = vld [vmem:[%s2761_s20 + $0x38] sm:$0xff] }
 0xc0a   : > { %2073 = vmatpush.msrb.mxu3 %v2055_v40 }
 0xc10   : > { %v1837_v52 = vpop.permute.xlu0 %1836 }
 0xc11   : > { %v1857_v50 = vsel %vm479_vm3, %v3110_v21, %v1837_v52  ;;  %v2052_v52 = vld [vmem:[%s2761_s20 + $0x20] sm:$0xff] }
 0xc3f   : > { %v1853_v25 = vpop.permute.xlu0 %1852 }
 0xc4b   : > { %v1851_v42 = vpop.permute.xlu1 %1850 }
 0xc4c   : > { %v1860_v43 = vsel %vm1021_vm6, %v1858_v41, %v1851_v42  ;;  %v2054_v41 = vld [vmem:[%s2761_s20 + $0x30] sm:$0xff]  ;;  %v2053_v42 = vld [vmem:[%s2761_s20 + $0x28] sm:$0xff] }
 0xc4d   : > { %2409 = vmatmul.msk.f32.vlgmr.msrb.gmra.mxu2 %vm427_vm1, %v1860_v43  ;;  %2074 = vmatpush.msrb.mxu3 %v2054_v41  ;;  %v2051_v43 = vld [vmem:[%s2761_s20 + $0x18] sm:$0xff] }
 0xc4f   : > { %2075 = vmatpush.msrb.mxu3 %v2053_v42 }
 0xc51   : > { %2076 = vmatpush.msrb.mxu3 %v2052_v52 }
 0xc53   : > { %v1845_v44 = vpop.permute.xlu1 %1844  ;;  %2077 = vmatpush.msrb.mxu3 %v2051_v43 }
 0xc54   : > { %v1859_v45 = vsel %vm1018_vm5, %v1857_v50, %v1845_v44  ;;  %v2050_v50 = vld [vmem:[%s2761_s20 + $0x10] sm:$0xff]  ;;  %v2049_v44 = vld [vmem:[%s2761_s20 + $0x8] sm:$0xff] }
 0xc55   : > { %v1861_v46 = vsel %vm1021_vm6, %v1859_v45, %v1853_v25  ;;  %2078 = vmatpush.msrb.mxu3 %v2050_v50  ;;  %v2048_v45 = vld [vmem:[%s2761_s20] sm:$0xff] }
 0xc56   : > { %2410 = vmatmul.msk.f32.gmra.mxu2 %vm427_vm1, %v1861_v46 }
 0xc57   : > { %2079 = vmatpush.msrb.mxu3 %v2049_v44 }
 0xc59   : > { %2080 = vmatpush.msrb.mxu3 %v2048_v45 }
 0xcd0   : > { %v1906_v48 = vpop.f32.mrf.mxu2 }
 0xcd1   : > { %v1907_v49 = vadd.f32 %v1906_v48, %v1881_v13 }
 0xcd3   : > { %v1912_v51 = vadd.f32 %v1907_v49, %v3002_v28 }
 0xcd5   : > { %v1915_v10 = vsel %vm427_vm1, %v1912_v51, 0.0 }
 0xcd6   : > { %1916 = vadd.xlane.f32.xlu1 %v1915_v10 }
 0xcd9   : > { %v1909_v6 = vpop.f32.mrf.mxu2 }
 0xcda   : > { %v1910_v53 = vadd.f32 %v1909_v6, %v1881_v13 }
 0xcdc   : > { %v1913_v21 = vadd.f32 %v1910_v53, %v3007_v47 }
 0xcde   : > { %v1918_v24 = vsel %vm427_vm1, %v1913_v21, 0.0 }
 0xcdf   : > { %1919 = vadd.xlane.f32.xlu0 %v1918_v24 }
 0xcf3   : > { %1961 = vrot.lane.b32.xlu0 %v2542_v54, %s2672_s15 }
 0xcfb   : > { %2056 = vrot.lane.b32.xlu0 %v3180_v19, %s2672_s15 }
 0xd49   : > { %v1917_v57 = vpop.xlane.xlu1 %1916 }
 0xd4a   : > { %v1921_v58 = vmul.f32 %v1917_v57, %v2968_v7 }
 0xd4c   : > { %v1923_v12 = vsub.f32 %v1912_v51, %v1921_v58 }
 0xd4e   : > { %v1925_v28 = vmul.f32 %v1923_v12, %v1923_v12 }
 0xd50   : > { %v1927_v60 = vsel %vm427_vm1, %v1925_v28, 0.0 }
 0xd51   : > { %1928 = vadd.xlane.f32.xlu2 %v1927_v60 }
 0xd52   : > { %v1920_v61 = vpop.xlane.xlu0 %1919 }
 0xd53   : > { %v1922_v47 = vmul.f32 %v1920_v61, %v2968_v7 }
 0xd55   : > { %v1924_v62 = vsub.f32 %v1913_v21, %v1922_v47 }
 0xd57   : > { %v1926_v63 = vmul.f32 %v1924_v62, %v1924_v62 }
 0xd59   : > { %v1930_v59 = vsel %vm427_vm1, %v1926_v63, 0.0 }
 0xd5a   : > { %1931 = vadd.xlane.f32.xlu1 %v1930_v59 }
 0xd65   : > { %v1962_v33 = vpop.permute.xlu0 %1961 }
 0xd73   : > { %1966 = vrot.lane.b32.xlu1 %v2542_v54, %s2684_s22 }
 0xdc4   : > { %v1929_v56 = vpop.xlane.xlu2 %1928 }
 0xdc5   : > { %v1933_v8 = vmul.f32 %v1929_v56, %v2968_v7 }
 0xdc7   : > { %v1935_v9 = vadd.f32 1e-05, %v1933_v8 }
 0xdc9   : > { %2615 = vrsqrt.f32 %v1935_v9  ;;  %vm1943_vm15 = vweird.f32 %v1935_v9 }
 0xdcd   : > { %v1932_v14 = vpop.xlane.xlu1 %1931 }
 0xdce   : > { %v1934_v15 = vmul.f32 %v1932_v14, %v2968_v7 }
 0xdcf   : > { %v2616_v17 = vpop.eup %2615 }
 0xdd0   : > { %v1938_v18 = vmul.f32 %v2616_v17, %v1935_v9  ;;  %v1936_v2 = vadd.f32 1e-05, %v1934_v15  ;;  %vm1944_vm14 = vweird.f32 %v2616_v17 }
 0xdd1   : > { %vm1945_vm0 = vmor %vm1943_vm15, %vm1944_vm14 }
 0xdd2   : > { %v1939_v4 = vmul.f32 %v2616_v17, %v1938_v18  ;;  %2617 = vrsqrt.f32 %v1936_v2  ;;  %vm1953_vm4 = vweird.f32 %v1936_v2  ;;  %v2057_v18 = vpop.permute.xlu0 %2056 }
 0xdd4   : > { %v1940_v5 = vmul.f32 0.5, %v1939_v4 }
 0xdd6   : > { %v1941_v20 = vsub.f32 1.5, %v1940_v5 }
 0xdd8   : > { %v2618_v22 = vpop.eup %2617  ;;  %v1942_v26 = vmul.f32 %v2616_v17, %v1941_v20 }
 0xdd9   : > { %v1948_v23 = vmul.f32 %v2618_v22, %v1936_v2  ;;  %vm1954_vm3 = vweird.f32 %v2618_v22 }
 0xdda   : > { %v1946_v30 = vsel %vm1945_vm0, %v2616_v17, %v1942_v26  ;;  %vm1955_vm5 = vmor %vm1953_vm4, %vm1954_vm3 }
 0xddb   : > { %v1949_v27 = vmul.f32 %v2618_v22, %v1948_v23  ;;  %v1957_v16 = vmul.f32 %v1946_v30, %v1923_v12 }
 0xddd   : > { %v1950_v29 = vmul.f32 0.5, %v1949_v27  ;;  %v1964_v34 = vmul.f32 %v1962_v33, %v1957_v16 }
 0xddf   : > { %v1951_v31 = vsub.f32 1.5, %v1950_v29 }
 0xde1   : > { %v1952_v32 = vmul.f32 %v2618_v22, %v1951_v31 }
 0xde3   : > { %v1956_v3 = vsel %vm1955_vm5, %v2618_v22, %v1952_v32 }
 0xde4   : > { %v1958_v36 = vmul.f32 %v1956_v3, %v1924_v62 }
 0xde5   : > { %v1967_v35 = vpop.permute.xlu1 %1966 }
 0xde6   : > { %v3184_v37 = vadd.f32 %v1967_v35, %v1964_v34  ;;  %v1965_v38 = vmul.f32 %v1962_v33, %v1958_v36 }
 0xde8   : > { %2411 = vmatmul.msk.f32.vlgmr.msra.gmra.mxu0 %vm427_vm1, %v3184_v37  ;;  %v3188_v39 = vadd.f32 %v1967_v35, %v1965_v38 }
 0xdf0   : > { %2412 = vmatmul.msk.f32.gmra.mxu0 %vm427_vm1, %v3188_v39 }
 0xe65   : > { %v2002_v25 = vpop.f32.mrf.mxu0 }
 0xe66   : > { %v2003_v46 = vadd.f32 %v3180_v19, %v2002_v25 }
 0xe68   : > { %v2413_v13 = vmul.f32 -1.442695, %v2003_v46 }
 0xe6a   : > { %2619 = vpow2.f32 %v2413_v13 }
 0xe6d   : > { %v2005_v48 = vpop.f32.mrf.mxu0 }
 0xe6e   : > { %v2006_v49 = vadd.f32 %v3180_v19, %v2005_v48 }
 0xe70   : > { %v2620_v51 = vpop.eup %2619  ;;  %v2414_v10 = vmul.f32 -1.442695, %v2006_v49 }
 0xe71   : > { %v2014_v6 = vadd.f32 1.0, %v2620_v51 }
 0xe72   : > { %2621 = vpow2.f32 %v2414_v10  ;;  %v2544_v10 = vld [vmem:[%s2771_s28 + $0x4] ss:$0 sm:$0xff] }
 0xe73   : > { %2623 = vrcp.f32 %v2014_v6  ;;  %v2027_v58 = vand.u32 2147483648, %v2014_v6  ;;  %v2025_v28 = vand.u32 2147483647, %v2014_v6  ;;  %vm2021_vm7 = vweird.f32 %v2014_v6 }
 0xe75   : > { %v2028_v47 = vor.u32 1.1754944e-38, %v2027_v58  ;;  %vm2026_vm9 = vcmp.eq.f32.partialorder %v2025_v28, 8.507059e+37 }
 0xe78   : > { %v2622_v53 = vpop.eup %2621 }
 0xe79   : > { %v2624_v21 = vpop.eup %2623  ;;  %v2015_v24 = vadd.f32 1.0, %v2622_v53 }
 0xe7a   : > { %v2017_v54 = vmul.f32 %v2624_v21, %v2014_v6  ;;  %vm2022_vm6 = vweird.f32 %v2624_v21 }
 0xe7b   : > { %2625 = vrcp.f32 %v2015_v24  ;;  %vm2023_vm8 = vmor %vm2021_vm7, %vm2022_vm6  ;;  %v2042_v56 = vand.u32 2147483648, %v2015_v24  ;;  %v2040_v55 = vand.u32 2147483647, %v2015_v24  ;;  %vm2036_vm11 = vweird.f32 %v2015_v24 }
 0xe7c   : > { %v2018_v57 = vsub.f32 1.0, %v2017_v54 }
 0xe7d   : > { %v2043_v11 = vor.u32 1.1754944e-38, %v2042_v56  ;;  %vm2041_vm13 = vcmp.eq.f32.partialorder %v2040_v55, 8.507059e+37 }
 0xe7e   : > { %v2019_v12 = vmul.f32 %v2624_v21, %v2018_v57 }
 0xe80   : > { %v2020_v60 = vadd.f32 %v2624_v21, %v2019_v12 }
 0xe81   : > { %v2626_v61 = vpop.eup %2625 }
 0xe82   : > { %v2024_v62 = vsel %vm2023_vm8, %v2624_v21, %v2020_v60  ;;  %v2032_v63 = vmul.f32 %v2626_v61, %v2015_v24  ;;  %vm2037_vm10 = vweird.f32 %v2626_v61 }
 0xe83   : > { %v2029_v59 = vsel %vm2026_vm9, %v2028_v47, %v2024_v62  ;;  %vm2038_vm12 = vmor %vm2036_vm11, %vm2037_vm10 }
 0xe84   : > { %v2046_v0 = vmul.f32 %v2029_v59, %v2003_v46  ;;  %v2033_v1 = vsub.f32 1.0, %v2032_v63 }
 0xe86   : > { %v2034_v8 = vmul.f32 %v2626_v61, %v2033_v1  ;;  %2415 = vmatmul.msk.f32.vlgmr.msrb.gmra.mxu3 %vm465_vm2, %v2046_v0 }
 0xe88   : > { %v2035_v9 = vadd.f32 %v2626_v61, %v2034_v8 }
 0xe8a   : > { %v2039_v14 = vsel %vm2038_vm12, %v2626_v61, %v2035_v9 }
 0xe8b   : > { %v2044_v15 = vsel %vm2041_vm13, %v2043_v11, %v2039_v14 }
 0xe8c   : > { %v2047_v17 = vmul.f32 %v2044_v15, %v2006_v49 }
 0xe8e   : > { %2416 = vmatmul.msk.f32.gmra.mxu3 %vm465_vm2, %v2047_v17 }
 0xf09   : > { %v2082_v2 = vpop.f32.mrf.mxu3 }
 0xf0a   : > { %v2083_v4 = vadd.f32 %v2082_v2, %v2057_v18 }
 0xf0c   : > { %v2088_v5 = vadd.f32 %v2083_v4, %v3184_v37 }
 0xf0e   : > { %v2091_v20 = vsel %vm427_vm1, %v2088_v5, 0.0 }
 0xf0f   : > { %2092 = vadd.xlane.f32.xlu2 %v2091_v20 }
 0xf11   : > { %v2085_v22 = vpop.f32.mrf.mxu3 }
 0xf12   : > { %v2086_v23 = vadd.f32 %v2085_v22, %v2057_v18 }
 0xf14   : > { %v2089_v26 = vadd.f32 %v2086_v23, %v3188_v39 }
 0xf16   : > { %v2094_v27 = vsel %vm427_vm1, %v2089_v26, 0.0 }
 0xf17   : > { %2095 = vadd.xlane.f32.xlu0 %v2094_v27 }
 0xf82   : > { %v2093_v29 = vpop.xlane.xlu2 %2092 }
 0xf83   : > { %v2097_v30 = vmul.f32 %v2093_v29, %v2968_v7 }
 0xf85   : > { %v2099_v31 = vsub.f32 %v2088_v5, %v2097_v30 }
 0xf87   : > { %v2101_v16 = vmul.f32 %v2099_v31, %v2099_v31 }
 0xf89   : > { %v2103_v32 = vsel %vm427_vm1, %v2101_v16, 0.0 }
 0xf8a   : > { %v2096_v33 = vpop.xlane.xlu0 %2095  ;;  %2104 = vadd.xlane.f32.xlu2 %v2103_v32 }
 0xf8b   : > { %v2098_v3 = vmul.f32 %v2096_v33, %v2968_v7 }
 0xf8d   : > { %v2100_v34 = vsub.f32 %v2089_v26, %v2098_v3 }
 0xf8f   : > { %v2102_v35 = vmul.f32 %v2100_v34, %v2100_v34 }
 0xf91   : > { %v2106_v36 = vsel %vm427_vm1, %v2102_v35, 0.0 }
 0xf92   : > { %2107 = vadd.xlane.f32.xlu1 %v2106_v36 }
 0xfa2   : > { %2135 = vrot.lane.b32.xlu2 %v3180_v19, %s2684_s22 }
 0xffd   : > { %v2105_v37 = vpop.xlane.xlu2 %2104 }
 0xffe   : > { %v2109_v38 = vmul.f32 %v2105_v37, %v2968_v7 }
0x1000   : > { %v2111_v39 = vadd.f32 1e-05, %v2109_v38 }
0x1002   : > { %2627 = vrsqrt.f32 %v2111_v39  ;;  %vm2119_vm14 = vweird.f32 %v2111_v39 }
0x1005   : > { %v2108_v40 = vpop.xlane.xlu1 %2107  ;;  %v2136_v49 = vpop.permute.xlu2 %2135 }
0x1006   : > { %v2110_v41 = vmul.f32 %v2108_v40, %v2968_v7 }
0x1008   : > { %v2628_v42 = vpop.eup %2627  ;;  %v2112_v52 = vadd.f32 1e-05, %v2110_v41 }
0x1009   : > { %v2114_v43 = vmul.f32 %v2628_v42, %v2111_v39  ;;  %vm2120_vm2 = vweird.f32 %v2628_v42 }
0x100a   : > { %2629 = vrsqrt.f32 %v2112_v52  ;;  %vm2121_vm15 = vmor %vm2119_vm14, %vm2120_vm2  ;;  %vm2129_vm3 = vweird.f32 %v2112_v52 }
0x100b   : > { %v2115_v50 = vmul.f32 %v2628_v42, %v2114_v43 }
0x100d   : > { %v2116_v44 = vmul.f32 0.5, %v2115_v50 }
0x100f   : > { %v2117_v25 = vsub.f32 1.5, %v2116_v44 }
0x1010   : > { %v2630_v45 = vpop.eup %2629 }
0x1011   : > { %v2124_v19 = vmul.f32 %v2630_v45, %v2112_v52  ;;  %v2118_v46 = vmul.f32 %v2628_v42, %v2117_v25  ;;  %vm2130_vm0 = vweird.f32 %v2630_v45 }
0x1012   : > { %vm2131_vm4 = vmor %vm2129_vm3, %vm2130_vm0 }
0x1013   : > { %v2125_v13 = vmul.f32 %v2630_v45, %v2124_v19  ;;  %v2122_v48 = vsel %vm2121_vm15, %v2628_v42, %v2118_v46 }
0x1014   : > { %v2133_v51 = vmul.f32 %v2122_v48, %v2099_v31 }
0x1015   : > { %v2126_v7 = vmul.f32 0.5, %v2125_v13 }
0x1016   : > { %v2138_v6 = vmul.f32 %v2136_v49, %v2133_v51 }
0x1017   : > { %v2127_v53 = vsub.f32 1.5, %v2126_v7 }
0x1018   : > { %v2143_v21 = vadd.f32 %v2544_v10, %v2138_v6 }
0x1019   : > { %v2128_v24 = vmul.f32 %v2630_v45, %v2127_v53 }
0x101a   : > { %2145 = vst.msk [vmem:[#allocation2] sm:$0xff] %vm427_vm1, %v2143_v21 }
0x101b   : > { %v2132_v54 = vsel %vm2131_vm4, %v2630_v45, %v2128_v24 }
0x101c   : > { %v2134_v57 = vmul.f32 %v2132_v54, %v2100_v34 }
0x101e   : > { %v2139_v58 = vmul.f32 %v2136_v49, %v2134_v57  ;;  %2150 = sbr.rel (%p2417_p5) target bundleno = 4269 (0x10ad), region = 60 }
0x1020   : > { %v2144_v12 = vadd.f32 %v2544_v10, %v2139_v58 }
0x1022   : > { %2146 = vst.msk [vmem:[#allocation2 + $0x8] sm:$0xff] %vm427_vm1, %v2144_v12 }
0x1023   : > { %v2154_v28 = vld [vmem:[%s3251_s6 + $0x18] sm:$0xff]  ;;  %v2153_v60 = vld [vmem:[%s3251_s6 + $0x10] sm:$0xff]  ;;  %v2152_v61 = vld [vmem:[%s3251_s6 + $0x8] sm:$0xff] }
0x1024   : > { %2177 = vmatpush.msra.mxu0 %v2154_v28  ;;  %2427 = vmatpush.msra.mxu1 %v2154_v28  ;;  %v2151_v47 = vld [vmem:[%s3251_s6] sm:$0xff] }
0x1025   : > { %v2631_v62 = vld [vmem:[%s3252_s7] ss:$0 sm:$0xff] }
0x1026   : > { %2178 = vmatpush.msra.mxu0 %v2153_v60  ;;  %2428 = vmatpush.msra.mxu1 %v2153_v60 }
0x1028   : > { %2179 = vmatpush.msra.mxu0 %v2152_v61  ;;  %2429 = vmatpush.msra.mxu1 %v2152_v61 }
0x102a   : > { %2180 = vmatpush.msra.mxu0 %v2151_v47  ;;  %2430 = vmatpush.msra.mxu1 %v2151_v47 }
0x102b   : > { %2418 = vmatmul.msk.f32.vlgmr.msra.gmra.mxu0 %vm427_vm1, %v2143_v21  ;;  %2419 = vmatmul.msk.f32.vlgmr.msra.gmra.mxu1 %vm427_vm1, %v2144_v12 }
0x10a8   : > { %v2182_v63 = vpop.f32.mrf.mxu0  ;;  %v2185_v59 = vpop.f32.mrf.mxu1 }
0x10a9   : > { %v2183_v0 = vadd.f32 %v2631_v62, %v2182_v63  ;;  %v2186_v1 = vadd.f32 %v2631_v62, %v2185_v59 }
0x10ab   : > { %2188 = vst [vmem:[#allocation3] sm:$0xff] %v2183_v0 }
0x10ac   : > { %2189 = vst [vmem:[#allocation3 + $0x8] sm:$0xff] %v2186_v1 }
0x10ad PF: > { %p2437_p6 = scmp.eq.s32.totalorder %s2752_s14, 1  ;;  %s2689_s19 = smov [#allocation3]  }
0x10ae   : > { %s2205_s27 = sshll.u32 %s2689_s19, 4  ;;  %s2207_s30 = sshll.u32 %s3253_s8, 4  ;;  %s2206_s27 = int_to_ptr.vmem [resolvable:$true] %s2205_s27  ;;  %s2208_s30 = int_to_ptr.hbm [resolvable:$true] %s2207_s30 }
0x10af   : > { %s2690_s26 = smov 128   ;;  %s3268_s29 = smov 8  }
0x10b0   : > { %2434 = dma.vmem_to_hbm [thread:$0]  (%p2437_p6), %s2206_s27, 256, %s2208_s30, [#allocation4], %s2690_s26, %s2690_s26, %s3268_s29  }
0x10b1   : > { %2665 = dma.done.wait (%p2437_p6), [#allocation4], 256  }
0x10b2   : > { %2667 = vsyncadd (%p2437_p6), [#allocation4], 4294967040 }
0x10b3 PF: > { %s22_s13 = sadd.s32 1, %s2670_s13  }
0x10b4   : > { %p19_p7 = scmp.ge.s32.totalorder %s22_s13, 4  }
0x10b6   :  { %21 = sbr.rel (!%p19_p7) target bundleno = 1 (0x1), region = 117 }
0x10bb   :  { %2246 = vsyncpa [#allocation4], 1 }
0x10bc   :  { %2248 = vsyncpa [#allocation4 + $0x1], 1 }

</bundles_post_ra>
